<compile_context>
chip_gen: v7x
topology: tpu7x:2x2x1
jax: 0.10.0
libtpu: 0.0.40
codegen_flags: <defaults>
</compile_context>

<pallas_src>
import functools

import jax
import jax.numpy as jnp
from jax import lax
from jax.experimental import pallas as pl
from jax.experimental.pallas import tpu as pltpu


def _attention_kernel(xf_ref, xq_ref, yq_ref, m_ref, wv_ref, bv_ref,
                      wt_ref, bt_ref, o_ref, acc_ref, *, fast_math):
    # xf_ref : (1, C, N)   full batch element (keys + residual)
    # xq_ref : (1, C, TQ)  query-column slice of x (input to v_conv)
    # yq_ref : (1, C, TQ)  query-column slice of y (input to q_conv)
    # m_ref  : (C, C)      precomputed Wqk^T @ Wqk
    # wv/wt  : (C, C), bv/bt : (C, 1)
    # acc_ref: (C+8, N)    rows 0..C-1: x_r numerator, row C: col_sum
    C = wv_ref.shape[0]
    qt = pl.program_id(1)
    n_qt = pl.num_programs(1)

    @pl.when(qt == 0)
    def _init():
        acc_ref[...] = jnp.zeros_like(acc_ref)

    x_full = xf_ref[0]                       # (C, N)
    x_q = xq_ref[0]                          # (C, TQ)
    y_q = yq_ref[0]                          # (C, TQ)
    tq = y_q.shape[1]

    mm_dtype = jnp.bfloat16 if fast_math else jnp.float32

    # ---- energy for this query tile (lane-dense all the way) -------------
    z = jnp.dot(m_ref[...], y_q, preferred_element_type=jnp.float32)     # (C, TQ)
    energy = lax.dot_general(z, x_full, (((0,), (0,)), ((), ())),
                             preferred_element_type=jnp.float32)         # (TQ, N)

    # ---- softmax numerator only; both normalizations folded out ----------
    e = jnp.exp(energy - jnp.max(energy, axis=-1, keepdims=True))        # (TQ, N)
    row_sum = jnp.sum(e, axis=-1, keepdims=True)                         # (TQ, 1)
    if fast_math:
        r = pl.reciprocal(row_sum, approx=True)
    else:
        r = 1.0 / row_sum
    r_row = r.reshape(1, tq)                                             # (1, TQ)

    # value projection on the query columns, softmax row-scale folded in
    x_v = jnp.dot(wv_ref[...], x_q,
                  preferred_element_type=jnp.float32) + bv_ref[...]      # (C, TQ)
    xv_scaled = x_v * r_row                                              # (C, TQ)

    # One MXU matmul yields both the x_r numerator (rows 0..C-1) and the
    # per-key column sum of the row-normalized attention (row C).
    lhs = jnp.concatenate(
        [xv_scaled, r_row, jnp.zeros((7, tq), jnp.float32)], axis=0)     # (C+8, TQ)
    acc_ref[...] += jnp.dot(lhs.astype(mm_dtype), e.astype(mm_dtype),
                            preferred_element_type=jnp.float32)          # (C+8, N)

    # ---- finalize on the last query tile ----------------------------------
    @pl.when(qt == n_qt - 1)
    def _finish():
        acc = acc_ref[...]
        x_r_num = acc[:C, :]                                             # (C, N)
        col_sum = acc[C:C + 1, :]                                        # (1, N)
        denom = 1e-7 + col_sum
        if fast_math:
            inv = pl.reciprocal(denom, approx=True)
        else:
            inv = 1.0 / denom
        x_r = x_r_num * inv                                              # (C, N)
        diff = x_full - x_r
        t = jnp.dot(wt_ref[...], diff,
                    preferred_element_type=jnp.float32) + bt_ref[...]
        t = jnp.maximum(t, 0.0)                                          # ReLU
        o_ref[0] = (x_full + t).astype(o_ref.dtype)


def _pick_query_tile(n, target=512):
    """Largest query tile <= target that keeps (1, C, TQ) blocks lane-legal."""
    if n <= target:
        return n
    best = 0
    t = 128
    while t <= target:
        if n % t == 0:
            best = t
        t += 128
    return best if best else n


def _default_vmem_limit_bytes():
    # ~75% of physical VMEM (v5e/v6e: 128 MiB, v7x: 64 MiB), capped at 100 MiB.
    try:
        cap = int(pltpu.get_tpu_info().vmem_capacity_bytes)
    except Exception:
        cap = 128 << 20
    return max(32 << 20, min((cap * 3) // 4, 100 << 20))


def attention_forward(x, y, w_qk, w_v, b_v, w_t, b_t, *, fast_math=False,
                      query_tile=None):
    """x, y: (B, C, N) float32 (native PyTorch layout). Returns (B, C, N)."""
    B, C, N = x.shape
    assert y.shape == (B, C, N)
    tq = query_tile or _pick_query_tile(N)
    assert N % tq == 0

    # Fold the shared q/k projection once (symmetric C x C matrix).
    m_qk = jnp.dot(w_qk.T, w_qk)
    bv2 = b_v.reshape(C, 1)
    bt2 = b_t.reshape(C, 1)

    full_batch = pl.BlockSpec((1, C, N), lambda b, q: (b, 0, 0))
    q_tile = pl.BlockSpec((1, C, tq), lambda b, q: (b, 0, q))
    full_cc = pl.BlockSpec((C, C), lambda b, q: (0, 0))
    full_c1 = pl.BlockSpec((C, 1), lambda b, q: (0, 0))
    # NOTE: constant weight/bias blocks could be single-buffered via
    # pipeline_mode=pl.Buffered(1); negligible at C=32, so omitted.

    kernel = functools.partial(_attention_kernel, fast_math=fast_math)

    return pl.pallas_call(
        kernel,
        out_shape=jax.ShapeDtypeStruct((B, C, N), x.dtype),
        grid_spec=pltpu.PrefetchScalarGridSpec(
            num_scalar_prefetch=0,
            grid=(B, N // tq),
            in_specs=[full_batch, q_tile, q_tile, full_cc, full_cc, full_c1,
                      full_cc, full_c1],
            out_specs=full_batch,
            scratch_shapes=[pltpu.VMEM((C + 8, N), jnp.float32)],
        ),
        compiler_params=pltpu.CompilerParams(
            dimension_semantics=("parallel", "arbitrary"),
            vmem_limit_bytes=_default_vmem_limit_bytes()),
    )(x, x, y, m_qk, w_v, bv2, w_t, bt2)


def attention_reference(x, y, w_qk, w_v, b_v, w_t, b_t):
    """Plain-JAX reference mirroring the PyTorch forward, (B, C, N) layout."""
    x_q = jnp.einsum('oc,bcn->bno', w_qk, y)                  # (B, N, C)
    x_k = jnp.einsum('oc,bcn->bon', w_qk, x)                  # (B, C, N)
    x_v = jnp.einsum('oc,bcn->bon', w_v, x) + b_v[None, :, None]
    energy = jnp.einsum('bnc,bcm->bnm', x_q, x_k)             # (B, Nq, Nk)
    attn = jax.nn.softmax(energy, axis=-1)
    attn = attn / (1e-7 + jnp.sum(attn, axis=1, keepdims=True))
    x_r = jnp.einsum('bck,bkn->bcn', x_v, attn)
    diff = x - x_r
    t = jnp.einsum('oc,bcn->bon', w_t, diff) + b_t[None, :, None]
    t = jnp.maximum(t, 0.0)
    return x + t


if __name__ == "__main__":
    B, C, N = 2, 32, 128   # small demo; N=128 keeps the lane axis fully dense

    key = jax.random.PRNGKey(0)
    kx, ky, k1, k2, k3, k4, k5 = jax.random.split(key, 7)

    # Conv1d(kernel_size=1) weights -> (C_out, C_in); q/k shared, bias-free.
    w_qk = jax.random.normal(k1, (C, C), jnp.float32) * 0.05
    w_v = jax.random.normal(k2, (C, C), jnp.float32) * 0.05
    b_v = jax.random.normal(k3, (C,), jnp.float32) * 0.05
    w_t = jax.random.normal(k4, (C, C), jnp.float32) * 0.05
    b_t = jax.random.normal(k5, (C,), jnp.float32) * 0.05

    x = jax.random.normal(kx, (B, C, N), jnp.float32)
    y = jax.random.normal(ky, (B, C, N), jnp.float32)

    ref = attention_reference(x, y, w_qk, w_v, b_v, w_t, b_t)

    # precise (f32 MXU accumulation, exact divisions) path
    out = attention_forward(x, y, w_qk, w_v, b_v, w_t, b_t, fast_math=False)
    out = jax.block_until_ready(out)
    assert out.shape == (B, C, N)
    # Default TPU matmul precision (single-pass bf16 on the MXU, used by both
    # the reference einsums and the kernel) bounds achievable agreement between
    # the two differently-factored computations -> moderate tolerance.
    assert jnp.allclose(out, ref, atol=1e-2, rtol=1e-2), "f32 path mismatch"

    # fast-math (bf16 K=N matmul + approx reciprocals) path
    out_fast = attention_forward(x, y, w_qk, w_v, b_v, w_t, b_t, fast_math=True)
    out_fast = jax.block_until_ready(out_fast)
    assert out_fast.shape == (B, C, N)
    assert jnp.allclose(out_fast, ref, atol=5e-2, rtol=5e-2), "fast-math mismatch"

    print("KERNEL_OK")
</pallas_src>

<mosaic_0001>
module attributes {stable_mosaic.version = 11 : i64} {
  func.func @_attention_kernel(%arg0: i32, %arg1: i32, %arg2: memref<1x32x128xf32, #tpu.memory_space<vmem>>, %arg3: memref<1x32x128xf32, #tpu.memory_space<vmem>>, %arg4: memref<1x32x128xf32, #tpu.memory_space<vmem>>, %arg5: memref<32x32xf32, #tpu.memory_space<vmem>>, %arg6: memref<32x32xf32, #tpu.memory_space<vmem>>, %arg7: memref<32x1xf32, #tpu.memory_space<vmem>>, %arg8: memref<32x32xf32, #tpu.memory_space<vmem>>, %arg9: memref<32x1xf32, #tpu.memory_space<vmem>>, %arg10: memref<1x32x128xf32, #tpu.memory_space<vmem>>, %arg11: memref<40x128xf32, #tpu.memory_space<vmem>>) attributes {dimension_semantics = [#tpu.dimension_semantics<parallel>, #tpu.dimension_semantics<arbitrary>], iteration_bounds = array<i64: 2, 1>, scalar_prefetch = 0 : i64, scratch_operands = 1 : i64, tpu.core_type = #tpu.core_type<tc>, window_params = [{transform_indices = @transform_0, window_bounds = array<i64: 1, 32, 128>}, {transform_indices = @transform_1, window_bounds = array<i64: 1, 32, 128>}, {transform_indices = @transform_2, window_bounds = array<i64: 1, 32, 128>}, {pipeline_mode = #tpu.pipeline_mode<synchronous>, transform_indices = @transform_3, window_bounds = array<i64: 32, 32>}, {pipeline_mode = #tpu.pipeline_mode<synchronous>, transform_indices = @transform_4, window_bounds = array<i64: 32, 32>}, {pipeline_mode = #tpu.pipeline_mode<synchronous>, transform_indices = @transform_5, window_bounds = array<i64: 32, 1>}, {pipeline_mode = #tpu.pipeline_mode<synchronous>, transform_indices = @transform_6, window_bounds = array<i64: 32, 32>}, {pipeline_mode = #tpu.pipeline_mode<synchronous>, transform_indices = @transform_7, window_bounds = array<i64: 32, 1>}, {transform_indices = @transform_8, window_bounds = array<i64: 1, 32, 128>}]} {
    %c0_i32 = arith.constant 0 : i32
    %0 = arith.cmpi eq, %arg1, %c0_i32 : i32
    %1 = arith.extui %0 : i1 to i32
    %c0_i32_0 = arith.constant 0 : i32
    %2 = arith.cmpi ne, %1, %c0_i32_0 : i32
    scf.if %2 {
      %cst_28 = arith.constant 0.000000e+00 : f32
      %38 = vector.broadcast %cst_28 : f32 to vector<40x128xf32>
      %c0_29 = arith.constant 0 : index
      %c0_30 = arith.constant 0 : index
      %39 = vector.load %arg11[%c0_29, %c0_30] : memref<40x128xf32, #tpu.memory_space<vmem>>, vector<40x128xf32>
      tpu.vector_store %arg11[%c0_29, %c0_30], %38 {strides = array<i32>} : memref<40x128xf32, #tpu.memory_space<vmem>>, vector<40x128xf32>,
    } else {
    }
    %c0 = arith.constant 0 : index
    %c0_1 = arith.constant 0 : index
    %c0_2 = arith.constant 0 : index
    %3 = vector.load %arg2[%c0, %c0_1, %c0_2] : memref<1x32x128xf32, #tpu.memory_space<vmem>>, vector<1x32x128xf32>
    %4 = vector.shape_cast %3 : vector<1x32x128xf32> to vector<32x128xf32>
    %c0_3 = arith.constant 0 : index
    %c0_4 = arith.constant 0 : index
    %c0_5 = arith.constant 0 : index
    %5 = vector.load %arg3[%c0_3, %c0_4, %c0_5] : memref<1x32x128xf32, #tpu.memory_space<vmem>>, vector<1x32x128xf32>
    %6 = vector.shape_cast %5 : vector<1x32x128xf32> to vector<32x128xf32>
    %c0_6 = arith.constant 0 : index
    %c0_7 = arith.constant 0 : index
    %c0_8 = arith.constant 0 : index
    %7 = vector.load %arg4[%c0_6, %c0_7, %c0_8] : memref<1x32x128xf32, #tpu.memory_space<vmem>>, vector<1x32x128xf32>
    %8 = vector.shape_cast %7 : vector<1x32x128xf32> to vector<32x128xf32>
    %c0_9 = arith.constant 0 : index
    %c0_10 = arith.constant 0 : index
    %9 = vector.load %arg5[%c0_9, %c0_10] : memref<32x32xf32, #tpu.memory_space<vmem>>, vector<32x32xf32>
    %cst = arith.constant dense<0.000000e+00> : vector<32x128xf32>
    %10 = tpu.matmul %9, %8, %cst {dimension_numbers = #tpu.dot_dimension_numbers<[1], [0], [0], [1], [0, 0, 1, 1], [], []>} : vector<32x32xf32>, vector<32x128xf32>, vector<32x128xf32> -> vector<32x128xf32>
    %cst_11 = arith.constant dense<0.000000e+00> : vector<128x128xf32>
    %11 = tpu.matmul %10, %4, %cst_11 {dimension_numbers = #tpu.dot_dimension_numbers<[0], [0], [1], [1], [0, 1, 1, 1], [], []>} : vector<32x128xf32>, vector<32x128xf32>, vector<128x128xf32> -> vector<128x128xf32>
    %cst_12 = arith.constant dense<0xFF800000> : vector<128xf32>
    %12 = vector.multi_reduction <maximumf>, %11, %cst_12 [1] : vector<128x128xf32> to vector<128xf32>
    %13 = vector.shape_cast %12 : vector<128xf32> to vector<128x1xf32>
    %14 = vector.broadcast %13 : vector<128x1xf32> to vector<128x128xf32>
    %15 = arith.subf %11, %14 : vector<128x128xf32>
    %16 = math.exp %15 : vector<128x128xf32>
    %cst_13 = arith.constant dense<0.000000e+00> : vector<128xf32>
    %17 = vector.multi_reduction <add>, %16, %cst_13 [1] : vector<128x128xf32> to vector<128xf32>
    %18 = vector.shape_cast %17 : vector<128xf32> to vector<128x1xf32>
    %cst_14 = arith.constant 1.000000e+00 : f32
    %19 = vector.broadcast %cst_14 : f32 to vector<128x1xf32>
    %20 = arith.divf %19, %18 : vector<128x1xf32>
    %21 = vector.shape_cast %20 : vector<128x1xf32> to vector<1x128xf32>
    %c0_15 = arith.constant 0 : index
    %c0_16 = arith.constant 0 : index
    %22 = vector.load %arg6[%c0_15, %c0_16] : memref<32x32xf32, #tpu.memory_space<vmem>>, vector<32x32xf32>
    %cst_17 = arith.constant dense<0.000000e+00> : vector<32x128xf32>
    %23 = tpu.matmul %22, %6, %cst_17 {dimension_numbers = #tpu.dot_dimension_numbers<[1], [0], [0], [1], [0, 0, 1, 1], [], []>} : vector<32x32xf32>, vector<32x128xf32>, vector<32x128xf32> -> vector<32x128xf32>
    %c0_18 = arith.constant 0 : index
    %c0_19 = arith.constant 0 : index
    %24 = vector.load %arg7[%c0_18, %c0_19] : memref<32x1xf32, #tpu.memory_space<vmem>>, vector<32x1xf32>
    %25 = vector.broadcast %24 : vector<32x1xf32> to vector<32x128xf32>
    %26 = arith.addf %23, %25 : vector<32x128xf32>
    %27 = vector.broadcast %21 : vector<1x128xf32> to vector<32x128xf32>
    %28 = arith.mulf %26, %27 : vector<32x128xf32>
    %cst_20 = arith.constant 0.000000e+00 : f32
    %29 = vector.broadcast %cst_20 : f32 to vector<7x128xf32>
    %30 = tpu.concatenate %28, %21, %29 in 0 : vector<32x128xf32>, vector<1x128xf32>, vector<7x128xf32> -> vector<40x128xf32>
    %c0_21 = arith.constant 0 : index
    %c0_22 = arith.constant 0 : index
    %31 = vector.load %arg11[%c0_21, %c0_22] : memref<40x128xf32, #tpu.memory_space<vmem>>, vector<40x128xf32>
    %cst_23 = arith.constant dense<0.000000e+00> : vector<40x128xf32>
    %32 = tpu.matmul %30, %16, %cst_23 {dimension_numbers = #tpu.dot_dimension_numbers<[1], [0], [0], [1], [0, 0, 1, 1], [], []>} : vector<40x128xf32>, vector<128x128xf32>, vector<40x128xf32> -> vector<40x128xf32>
    %33 = arith.addf %31, %32 : vector<40x128xf32>
    %c0_24 = arith.constant 0 : index
    %c0_25 = arith.constant 0 : index
    %34 = vector.load %arg11[%c0_24, %c0_25] : memref<40x128xf32, #tpu.memory_space<vmem>>, vector<40x128xf32>
    tpu.vector_store %arg11[%c0_24, %c0_25], %33 {strides = array<i32>} : memref<40x128xf32, #tpu.memory_space<vmem>>, vector<40x128xf32>,
    %c0_i32_26 = arith.constant 0 : i32
    %35 = arith.cmpi eq, %arg1, %c0_i32_26 : i32
    %36 = arith.extui %35 : i1 to i32
    %c0_i32_27 = arith.constant 0 : i32
    %37 = arith.cmpi ne, %36, %c0_i32_27 : i32
    scf.if %37 {
      %c0_28 = arith.constant 0 : index
      %c0_29 = arith.constant 0 : index
      %38 = vector.load %arg11[%c0_28, %c0_29] : memref<40x128xf32, #tpu.memory_space<vmem>>, vector<40x128xf32>
      %39 = vector.extract_strided_slice %38 {offsets = [0, 0], sizes = [32, 128], strides = [1, 1]} : vector<40x128xf32> to vector<32x128xf32>
      %40 = vector.extract_strided_slice %38 {offsets = [32, 0], sizes = [1, 128], strides = [1, 1]} : vector<40x128xf32> to vector<1x128xf32>
      %cst_30 = arith.constant 1.000000e-07 : f32
      %41 = vector.broadcast %cst_30 : f32 to vector<1x128xf32>
      %42 = arith.addf %41, %40 : vector<1x128xf32>
      %cst_31 = arith.constant 1.000000e+00 : f32
      %43 = vector.broadcast %cst_31 : f32 to vector<1x128xf32>
      %44 = arith.divf %43, %42 : vector<1x128xf32>
      %45 = vector.broadcast %44 : vector<1x128xf32> to vector<32x128xf32>
      %46 = arith.mulf %39, %45 : vector<32x128xf32>
      %47 = arith.subf %4, %46 : vector<32x128xf32>
      %c0_32 = arith.constant 0 : index
      %c0_33 = arith.constant 0 : index
      %48 = vector.load %arg8[%c0_32, %c0_33] : memref<32x32xf32, #tpu.memory_space<vmem>>, vector<32x32xf32>
      %cst_34 = arith.constant dense<0.000000e+00> : vector<32x128xf32>
      %49 = tpu.matmul %48, %47, %cst_34 {dimension_numbers = #tpu.dot_dimension_numbers<[1], [0], [0], [1], [0, 0, 1, 1], [], []>} : vector<32x32xf32>, vector<32x128xf32>, vector<32x128xf32> -> vector<32x128xf32>
      %c0_35 = arith.constant 0 : index
      %c0_36 = arith.constant 0 : index
      %50 = vector.load %arg9[%c0_35, %c0_36] : memref<32x1xf32, #tpu.memory_space<vmem>>, vector<32x1xf32>
      %51 = vector.broadcast %50 : vector<32x1xf32> to vector<32x128xf32>
      %52 = arith.addf %49, %51 : vector<32x128xf32>
      %cst_37 = arith.constant 0.000000e+00 : f32
      %53 = vector.broadcast %cst_37 : f32 to vector<32x128xf32>
      %54 = arith.maximumf %52, %53 : vector<32x128xf32>
      %55 = arith.addf %4, %54 : vector<32x128xf32>
      %c0_38 = arith.constant 0 : index
      %c0_39 = arith.constant 0 : index
      %c0_40 = arith.constant 0 : index
      %56 = vector.load %arg10[%c0_38, %c0_39, %c0_40] : memref<1x32x128xf32, #tpu.memory_space<vmem>>, vector<1x32x128xf32>
      %57 = vector.shape_cast %56 : vector<1x32x128xf32> to vector<32x128xf32>
      %58 = vector.shape_cast %55 : vector<32x128xf32> to vector<1x32x128xf32>
      tpu.vector_store %arg10[%c0_38, %c0_39, %c0_40], %58 {strides = array<i32>} : memref<1x32x128xf32, #tpu.memory_space<vmem>>, vector<1x32x128xf32>,
    } else {
    }
    return
  }
  func.func @transform_0(%arg0: i32, %arg1: i32) -> (i32, i32, i32) {
    %c0_i32 = arith.constant 0 : i32
    %c0_i32_0 = arith.constant 0 : i32
    %c0_i32_1 = arith.constant 0 : i32
    return %arg0, %c0_i32, %c0_i32_0 : i32, i32, i32
  }
  func.func @transform_1(%arg0: i32, %arg1: i32) -> (i32, i32, i32) {
    %c0_i32 = arith.constant 0 : i32
    %c0_i32_0 = arith.constant 0 : i32
    return %arg0, %c0_i32, %arg1 : i32, i32, i32
  }
  func.func @transform_2(%arg0: i32, %arg1: i32) -> (i32, i32, i32) {
    %c0_i32 = arith.constant 0 : i32
    %c0_i32_0 = arith.constant 0 : i32
    return %arg0, %c0_i32, %arg1 : i32, i32, i32
  }
  func.func @transform_3(%arg0: i32, %arg1: i32) -> (i32, i32) {
    %c0_i32 = arith.constant 0 : i32
    %c0_i32_0 = arith.constant 0 : i32
    %c0_i32_1 = arith.constant 0 : i32
    return %c0_i32, %c0_i32_0 : i32, i32
  }
  func.func @transform_4(%arg0: i32, %arg1: i32) -> (i32, i32) {
    %c0_i32 = arith.constant 0 : i32
    %c0_i32_0 = arith.constant 0 : i32
    %c0_i32_1 = arith.constant 0 : i32
    return %c0_i32, %c0_i32_0 : i32, i32
  }
  func.func @transform_5(%arg0: i32, %arg1: i32) -> (i32, i32) {
    %c0_i32 = arith.constant 0 : i32
    %c0_i32_0 = arith.constant 0 : i32
    %c0_i32_1 = arith.constant 0 : i32
    return %c0_i32, %c0_i32_0 : i32, i32
  }
  func.func @transform_6(%arg0: i32, %arg1: i32) -> (i32, i32) {
    %c0_i32 = arith.constant 0 : i32
    %c0_i32_0 = arith.constant 0 : i32
    %c0_i32_1 = arith.constant 0 : i32
    return %c0_i32, %c0_i32_0 : i32, i32
  }
  func.func @transform_7(%arg0: i32, %arg1: i32) -> (i32, i32) {
    %c0_i32 = arith.constant 0 : i32
    %c0_i32_0 = arith.constant 0 : i32
    %c0_i32_1 = arith.constant 0 : i32
    return %c0_i32, %c0_i32_0 : i32, i32
  }
  func.func @transform_8(%arg0: i32, %arg1: i32) -> (i32, i32, i32) {
    %c0_i32 = arith.constant 0 : i32
    %c0_i32_0 = arith.constant 0 : i32
    %c0_i32_1 = arith.constant 0 : i32
    return %arg0, %c0_i32, %c0_i32_0 : i32, i32, i32
  }
}

</mosaic_0001>

<bundles_post_ra>
// kernel: tpu_custom_call.1
= control target key start
LH: loop header
LB: loop body
LE: loop exit
PB: predicated region body
PF: predicated region fallthrough
CT: control target
= control target key end

     0   :  { %s3200_s0 = inlined_call_operand.hbm [shape: f32[2,32,128], index: 0, kind: input, shape index: {}]   ;;  %s3201_s1 = inlined_call_operand.hbm [shape: f32[2,32,128], index: 1, kind: input, shape index: {}]   ;;  %s3202_s2 = inlined_call_operand.hbm [shape: f32[2,32,128], index: 2, kind: input, shape index: {}]   ;;  %s3203_s3 = inlined_call_operand.hbm [shape: f32[32,32], index: 3, kind: input, shape index: {}]   ;;  %s3204_s4 = inlined_call_operand.hbm [shape: f32[32,32], index: 4, kind: input, shape index: {}]   ;;  %s3205_s5 = inlined_call_operand.hbm [shape: f32[32,1], index: 5, kind: input, shape index: {}]   ;;  %s3206_s6 = inlined_call_operand.hbm [shape: f32[32,32], index: 6, kind: input, shape index: {}]   ;;  %s3207_s7 = inlined_call_operand.hbm [shape: f32[32,1], index: 7, kind: input, shape index: {}]   ;;  %s3208_s8 = inlined_call_operand.hbm [shape: f32[2,32,128], index: 8, kind: output, shape index: {}]  }
   0x1   :  { %3237 = sst [smem:[#allocation33_spill]] %s3201_s1 }
   0x2   :  { %3238 = sst [smem:[#allocation34_spill]] %s3203_s3 }
   0x3   :  { %3239 = sst [smem:[#allocation35_spill]] %s3205_s5 }
   0x4   :  { %3240 = sst [smem:[#allocation36_spill]] %s3208_s8 }
   0x5   :  { %13 = vsyncpa [#allocation4], 0 }
   0x6   :  { %15 = vsyncpa [#allocation4 + $0x1], 0 }
   0x7   :  { %16 = vsyncpa [#allocation7], 0 }
   0x8   :  { %18 = vsyncpa [#allocation7 + $0x1], 0 }
   0x9   :  { %19 = vsyncpa [#allocation10], 0 }
   0xa   :  { %20 = vsyncpa [#allocation13], 0 }
   0xb   :  { %21 = vsyncpa [#allocation16], 0 }
   0xc   :  { %22 = vsyncpa [#allocation5], 0 }
   0xd   :  { %24 = vsyncpa [#allocation5 + $0x1], 0  ;;  %s2610_s27 = smov 0   ;;  %s2612_s28 = smov 0  }
   0xe   :  { %s2614_s29 = smov 0   ;;  %s2616_s30 = smov 0  }
   0xf   :  { %s2618_s9 = smov 0   ;;  %s2620_s10 = smov 0  }
  0x10 LB: > { %3241 = sst [smem:[#allocation24_spill]] %s2526_s27  ;;  %s2641_s11 = sadd.s32 4294967295, %s2546_s10   ;;  %s2546_s10 = sphi %s2620_s10, %s30_s10   ;;  %s2542_s9 = sphi %s2618_s9, %s3290_s9   ;;  %s2538_s30 = sphi %s2616_s30, %s3289_s30   ;;  %s2534_s29 = sphi %s2614_s29, %s3293_s29   ;;  %s2530_s28 = sphi %s2612_s28, %s3292_s28   ;;  %s2526_s27 = sphi %s2610_s27, %s3291_s27  }
  0x11   : > { %3242 = sst [smem:[#allocation25_spill]] %s2538_s30  ;;  %p1713_p0 = scmp.ge.s32.totalorder %s2546_s10, 1 }
  0x12   : > { %3243 = sst [smem:[#allocation26_spill]] %s2542_s9  ;;  %p3220_p1 = scmp.eq.s32.totalorder %s2641_s11, 0 }
  0x13   : > { %3244 = sst [smem:[#allocation27_spill]] %s2546_s10  ;;  %p260_p3 = scmp.lt.s32.totalorder %s2546_s10, 3 }
  0x14   : > { %3245 = sst [smem:[#allocation28_spill]] %s2641_s11  ;;  %s2548_s13 = smov [#allocation9]  }
  0x15   : > { %p2647_p4 = pnand %p1713_p0, %p260_p3  ;;  %s272_s14 = sshll.u32 %s2548_s13, 4  ;;  %s2651_s14 = int_to_ptr.vmem [resolvable:$true] %s272_s14 }
  0x16   : > { %s2549_s16 = smov [#allocation12]   ;;  %s3248_s3 = sld [smem:[#allocation34_spill]] }
  0x17   : > { %s3246_s12 = scalar_select %p2647_p4, 1, 0 }
  0x18   : > { %p2047_p5 = pneg %p2647_p4  ;;  %s298_s17 = sshll.u32 %s2549_s16, 4  ;;  %s2662_s17 = int_to_ptr.vmem [resolvable:$true] %s298_s17 }
  0x1a   : > { %p2658_p7 = pnand %p2047_p5, %p3220_p1 }
  0x1c   : > { %s3247_s15 = scalar_select %p2658_p7, 1, 0 }
  0x1d   : > { %s2218_s20 = scalar_lea.hbm %s3248_s3, 512  ;;  %p2672_p9 = pneg %p2658_p7 }
  0x1e   : > { %p2219_p8 = scmp.ne.s32.totalorder %s3248_s3, %s2218_s20  ;;  %p2225_p12 = scmp.lt.u32.totalorder %s2218_s20, %s3248_s3 }
  0x1f   : > { %s3249_s23 = scalar_select %p2672_p9, 1, 0 }
  0x20   : > { %p2221_p10 = pnand %p2672_p9, %p2219_p8 }
  0x22   : > { %p2222_p11 = pneg %p2221_p10 }
  0x24   : > { %p2227_p13 = pnand %p2225_p12, %p2222_p11 }
  0x26   : > { %2230 = shalt.err (!%p2227_p13)
}
  0x27   : > { %s2231_s26 = scalar_lea.vmem %s2651_s14, 512  ;;  %p2239_p6 = scmp.lt.s32.totalorder %s2651_s14, %s2651_s14 }
  0x28   : > { %p2232_p0 = scmp.ne.s32.totalorder %s2651_s14, %s2231_s26  ;;  %p2240_p2 = scmp.lt.s32.totalorder %s2231_s26, %s2231_s26 }
  0x2a   : > { %p2234_p3 = pnand %p2232_p0, %p2672_p9  ;;  %p2241_p8 = por %p2240_p2, %p2239_p6 }
  0x2c   : > { %p2235_p5 = pneg %p2234_p3 }
  0x2e   : > { %p2242_p10 = pnand %p2241_p8, %p2235_p5 }
  0x30   : > { %2245 = shalt.err (!%p2242_p10)
}
  0x31   : > { %s3211_s13 = smov 128   ;;  %s3213_s16 = smov 8  }
  0x32   : > { %2050 = dma.hbm_to_vmem [thread:$0]  (!%p2658_p7), %s3248_s3, 512, %s2651_s14, [#allocation10], %s3211_s13, %s3211_s13, %s3213_s16  }
  0x33   : > { %s3250_s5 = sld [smem:[#allocation35_spill]] }
  0x39   : > { %s2246_s22 = scalar_lea.hbm %s3250_s5, 512 }
  0x3a   : > { %p2247_p2 = scmp.ne.s32.totalorder %s3250_s5, %s2246_s22  ;;  %p2253_p12 = scmp.lt.u32.totalorder %s2246_s22, %s3250_s5 }
  0x3c   : > { %p2249_p6 = pnand %p2247_p2, %p2672_p9 }
  0x3e   : > { %p2250_p11 = pneg %p2249_p6 }
  0x40   : > { %p2255_p13 = pnand %p2253_p12, %p2250_p11 }
  0x42   : > { %2258 = shalt.err (!%p2255_p13)
}
  0x43   : > { %s2259_s14 = scalar_lea.vmem %s2662_s17, 512  ;;  %p2267_p8 = scmp.lt.s32.totalorder %s2662_s17, %s2662_s17 }
  0x44   : > { %p2260_p0 = scmp.ne.s32.totalorder %s2662_s17, %s2259_s14  ;;  %p2268_p10 = scmp.lt.s32.totalorder %s2259_s14, %s2259_s14 }
  0x46   : > { %p2262_p3 = pnand %p2260_p0, %p2672_p9  ;;  %p2269_p2 = por %p2268_p10, %p2267_p8 }
  0x48   : > { %p2263_p5 = pneg %p2262_p3 }
  0x4a   : > { %p2270_p6 = pnand %p2269_p2, %p2263_p5 }
  0x4c   : > { %2273 = shalt.err (!%p2270_p6)
}
  0x4d   : > { %2056 = dma.hbm_to_vmem [thread:$0]  (!%p2658_p7), %s3250_s5, 512, %s2662_s17, [#allocation13], %s3211_s13, %s3211_s13, %s3213_s16  }
  0x4e   : > { %s1712_s19 = sadd.s32 4294967294, %s2546_s10   ;;  %s42_s20 = sadd.s32 1, %s2542_s9 }
  0x4f   : > { %s49_s21 = sadd.s32 1, %s2534_s29  ;;  %p44_p11 = scmp.ge.s32.totalorder %s42_s20, 2 }
  0x50   : > { %p56_p12 = scmp.ne.s32.totalorder %s2534_s29, %s2530_s28  ;;  %p57_p13 = scmp.eq.s32.totalorder %s2546_s10, 0 }
  0x51   : > { %p62_p0 = scmp.ne.s32.totalorder %s2530_s28, %s2526_s27  ;;  %s3295_s20 = smov (%p44_p11, %s42_s20), 0 }
  0x52   : > { %3251 = sst [smem:[#allocation29_spill]] %s3295_s20  ;;  %p58_p3 = por %p57_p13, %p56_p12 }
  0x53   : > { %p2734_p5 = por %p3220_p1, %p62_p0  ;;  %s46_s17 = ssub.s32 %s2542_s9, %s3295_s20 }
  0x54   : > { %p3253_p8 = scmp.eq.s32.totalorder %s2641_s11, 1  ;;  %p47_p2 = scmp.eq.s32.totalorder %s46_s17, 0 }
  0x55   : > { %s3252_s22 = scalar_select %p2734_p5, 1, 0 }
  0x56   : > { %p2742_p10 = por %p3253_p8, %p56_p12  ;;  %p253_p6 = scmp.eq.s32.totalorder %s1712_s19, 1 }
  0x57   : > { %p2082_p4 = scmp.lt.s32.totalorder %s2546_s10, 2  ;;  %s3215_s25 = sand.u32 1, %s2534_s29  }
  0x58   : > { %s3254_s24 = scalar_select %p2742_p10, 1, 0 }
  0x59   : > { %s2749_s26 = scalar_select %p47_p2, %s2534_s29, %s49_s21  }
  0x5a   : > { %3255 = sst [smem:[#allocation30_spill]] %s3254_s24  ;;  %p2751_p11 = por %p253_p6, %p62_p0 }
  0x5b   : > { %3256 = sst [smem:[#allocation31_spill]] %s2749_s26  ;;  %s2757_s8 = sshll.u32 %s3215_s25, 5 }
  0x5c   : > { %s3257_s14 = scalar_select %p2751_p11, 1, 0 }
  0x5d   : > { %s2760_s18 = sshll.u32 %s2542_s9, 9  ;;  %p2762_p12 = pnand %p2082_p4, %p58_p3 }
  0x5e   : > { %3258 = sst [smem:[#allocation32_spill]] %s3257_s14  ;;  %s359_s19 = sand.u32 1, %s2546_s10  }
  0x5f   : > { %s3259_s13 = scalar_select %p2762_p12, 1, 0 }
  0x60   : > { %s3260_s1 = sld [smem:[#allocation33_spill]]  ;;  %s363_s25 = scalar_lea.vmem [#allocation6], %s2757_s8 }
  0x61   : > { %s371_s3 = sshll.u32 %s363_s25, 4  ;;  %s2776_s5 = scalar_lea.sflag [#allocation7], %s359_s19  ;;  %s2774_s3 = int_to_ptr.vmem [resolvable:$true] %s371_s3 }
  0x62   : > { %p2782_p13 = pneg %p2762_p12 }
  0x64   : > { %s3261_s9 = scalar_select %p2782_p13, 1, 0 }
  0x66   : > { %s2771_s16 = scalar_lea.hbm %s3260_s1, %s2760_s18  ;;  %s2279_s26 = scalar_lea.hbm %s3260_s1, 1024 }
  0x67   : > { %s2274_s20 = scalar_lea.hbm %s2771_s16, 512  ;;  %p2280_p8 = scmp.lt.u32.totalorder %s2771_s16, %s3260_s1 }
  0x68   : > { %p2275_p4 = scmp.ne.s32.totalorder %s2771_s16, %s2274_s20  ;;  %p2281_p2 = scmp.lt.u32.totalorder %s2279_s26, %s2274_s20 }
  0x69   : > { %p2283_p1 = scmp.lt.u32.totalorder %s2274_s20, %s2771_s16 }
  0x6a   : > { %p2277_p0 = pnand %p2782_p13, %p2275_p4  ;;  %p2282_p6 = por %p2281_p2, %p2280_p8 }
  0x6c   : > { %p2278_p3 = pneg %p2277_p0  ;;  %p2284_p11 = por %p2283_p1, %p2282_p6 }
  0x6e   : > { %p2285_p10 = pnand %p2284_p11, %p2278_p3 }
  0x70   : > { %2288 = shalt.err (!%p2285_p10)
}
  0x71   : > { %s2289_s19 = scalar_lea.vmem %s2774_s3, 512  ;;  %s2552_s17 = smov [#allocation6]  }
  0x72   : > { %p2290_p4 = scmp.ne.s32.totalorder %s2774_s3, %s2289_s19  ;;  %s2294_s21 = sshll.u32 %s2552_s17, 4  ;;  %s2295_s21 = int_to_ptr.vmem [resolvable:$false] %s2294_s21 }
  0x73   : > { %s2296_s10 = scalar_lea.vmem %s2295_s21, 1024  ;;  %p2297_p7 = scmp.lt.s32.totalorder %s2774_s3, %s2295_s21 }
  0x74   : > { %p2292_p0 = pnand %p2290_p4, %p2782_p13  ;;  %p2298_p9 = scmp.lt.s32.totalorder %s2296_s10, %s2289_s19 }
  0x76   : > { %p2293_p5 = pneg %p2292_p0  ;;  %p2299_p8 = por %p2298_p9, %p2297_p7 }
  0x78   : > { %p2300_p2 = pnand %p2299_p8, %p2293_p5 }
  0x7a   : > { %2303 = shalt.err (!%p2300_p2)
}
  0x7b   : > { %s3262_s20 = smov 8   ;;  %s3263_s26 = smov 128  }
  0x7c   : > { %2069 = dma.hbm_to_vmem [thread:$0]  (!%p2762_p12), %s2771_s16, 512, %s2774_s3, %s2776_s5, %s3263_s26, %s3263_s26, %s3262_s20  }
  0x7d   : > { %s2553_s25 = smov [#allocation11]   ;;  %s2554_s17 = smov [#allocation14]  }
  0x7e   : > { %s285_s1 = sshll.u32 %s2553_s25, 4  ;;  %s311_s14 = sshll.u32 %s2554_s17, 4  ;;  %s286_s1 = int_to_ptr.vmem [resolvable:$true] %s285_s1  ;;  %s312_s14 = int_to_ptr.vmem [resolvable:$true] %s311_s14 }
  0x7f   : > { %s2304_s10 = scalar_lea.hbm %s3204_s4, 512  ;;  %p3264_p7 = scmp.ne.s32.totalorder %s3249_s23, 0 }
  0x80   : > { %p2305_p1 = scmp.ne.s32.totalorder %s3204_s4, %s2304_s10  ;;  %p2311_p10 = scmp.lt.u32.totalorder %s2304_s10, %s3204_s4 }
  0x82   : > { %p2307_p9 = pnand %p2305_p1, %p3264_p7 }
  0x84   : > { %p2308_p5 = pneg %p2307_p9 }
  0x86   : > { %p2313_p11 = pnand %p2311_p10, %p2308_p5 }
  0x88   : > { %2316 = shalt.err (!%p2313_p11)
}
  0x89   : > { %s2317_s3 = scalar_lea.vmem %s286_s1, 512  ;;  %p2325_p0 = scmp.lt.s32.totalorder %s286_s1, %s286_s1 }
  0x8a   : > { %p2318_p3 = scmp.ne.s32.totalorder %s286_s1, %s2317_s3  ;;  %p2326_p8 = scmp.lt.s32.totalorder %s2317_s3, %s2317_s3 }
  0x8c   : > { %p2320_p6 = pnand %p2318_p3, %p3264_p7  ;;  %p2327_p2 = por %p2326_p8, %p2325_p0 }
  0x8e   : > { %p2321_p4 = pneg %p2320_p6 }
  0x90   : > { %p2328_p12 = pnand %p2327_p2, %p2321_p4 }
  0x92   : > { %2331 = shalt.err (!%p2328_p12)
}
  0x93   : > { %p3265_p1 = scmp.ne.s32.totalorder %s3247_s15, 0  ;;  %s2332_s24 = scalar_lea.hbm %s3206_s6, 512 }
  0x94   : > { %p2333_p9 = scmp.ne.s32.totalorder %s3206_s6, %s2332_s24  ;;  %p2339_p10 = scmp.lt.u32.totalorder %s2332_s24, %s3206_s6 }
  0x95   : > { %2053 = dma.hbm_to_vmem [thread:$0]  (!%p3265_p1), %s3204_s4, 512, %s286_s1, [#allocation10], %s3263_s26, %s3263_s26, %s3262_s20  }
  0x96   : > { %p2335_p12 = pnand %p2333_p9, %p3264_p7 }
  0x98   : > { %p2336_p5 = pneg %p2335_p12 }
  0x9a   : > { %p2341_p11 = pnand %p2339_p10, %p2336_p5 }
  0x9c   : > { %2344 = shalt.err (!%p2341_p11)
}
  0x9d   : > { %s2345_s10 = scalar_lea.vmem %s312_s14, 512  ;;  %p2353_p0 = scmp.lt.s32.totalorder %s312_s14, %s312_s14 }
  0x9e   : > { %p2346_p3 = scmp.ne.s32.totalorder %s312_s14, %s2345_s10  ;;  %p2354_p8 = scmp.lt.s32.totalorder %s2345_s10, %s2345_s10 }
  0xa0   : > { %p2348_p6 = pnand %p2346_p3, %p3264_p7  ;;  %p2355_p2 = por %p2354_p8, %p2353_p0 }
  0xa2   : > { %p2349_p4 = pneg %p2348_p6 }
  0xa4   : > { %p2356_p13 = pnand %p2355_p2, %p2349_p4 }
  0xa6   : > { %2359 = shalt.err (!%p2356_p13)
}
  0xa7   : > { %2059 = dma.hbm_to_vmem [thread:$0]  (!%p3265_p1), %s3206_s6, 512, %s312_s14, [#allocation13], %s3263_s26, %s3263_s26, %s3262_s20  }
  0xa8   : > { %s2555_s27 = smov [#allocation15]   ;;  %s2360_s24 = scalar_lea.hbm %s3207_s7, 512 }
  0xa9   : > { %s324_s30 = sshll.u32 %s2555_s27, 4  ;;  %p2361_p13 = scmp.ne.s32.totalorder %s3207_s7, %s2360_s24  ;;  %s325_s30 = int_to_ptr.vmem [resolvable:$true] %s324_s30 }
  0xaa   : > { %p2367_p5 = scmp.lt.u32.totalorder %s2360_s24, %s3207_s7 }
  0xab   : > { %p2363_p9 = pnand %p2361_p13, %p3264_p7 }
  0xad   : > { %p2364_p12 = pneg %p2363_p9 }
  0xaf   : > { %p2369_p10 = pnand %p2367_p5, %p2364_p12 }
  0xb1   : > { %2372 = shalt.err (!%p2369_p10)
}
  0xb2   : > { %s2373_s14 = scalar_lea.vmem %s325_s30, 512  ;;  %p2381_p4 = scmp.lt.s32.totalorder %s325_s30, %s325_s30 }
  0xb3   : > { %p2374_p11 = scmp.ne.s32.totalorder %s325_s30, %s2373_s14  ;;  %p2382_p0 = scmp.lt.s32.totalorder %s2373_s14, %s2373_s14 }
  0xb5   : > { %p2376_p3 = pnand %p2374_p11, %p3264_p7  ;;  %p2383_p8 = por %p2382_p0, %p2381_p4 }
  0xb7   : > { %p2377_p6 = pneg %p2376_p3 }
  0xb9   : > { %p2384_p2 = pnand %p2383_p8, %p2377_p6 }
  0xbb   : > { %2387 = shalt.err (!%p2384_p2)
}
  0xbc   : > { %2062 = dma.hbm_to_vmem [thread:$0]  (!%p3265_p1), %s3207_s7, 512, %s325_s30, [#allocation16], %s3263_s26, %s3263_s26, %s3262_s20  }
  0xbd   : > { %s2876_s27 = scalar_lea.hbm %s3200_s0, %s2760_s18  ;;  %s342_s15 = scalar_lea.vmem [#allocation3], %s2757_s8 }
  0xbe   : > { %s349_s11 = sshll.u32 %s342_s15, 4  ;;  %s3266_s16 = sand.u32 1, %s2534_s29   ;;  %s2879_s11 = int_to_ptr.vmem [resolvable:$true] %s349_s11 }
  0xbf   : > { %s2883_s24 = scalar_lea.sflag [#allocation4], %s3266_s16  ;;  %s2388_s25 = scalar_lea.hbm %s2876_s27, 512 }
  0xc0   : > { %p2389_p7 = scmp.ne.s32.totalorder %s2876_s27, %s2388_s25  ;;  %p3267_p13 = scmp.ne.s32.totalorder %s3261_s9, 0 }
  0xc1   : > { %s2393_s21 = scalar_lea.hbm %s3200_s0, 1024  ;;  %p2394_p12 = scmp.lt.u32.totalorder %s2876_s27, %s3200_s0 }
  0xc2   : > { %p2391_p1 = pnand %p2389_p7, %p3267_p13  ;;  %p2395_p5 = scmp.lt.u32.totalorder %s2393_s21, %s2388_s25 }
  0xc3   : > { %p2397_p11 = scmp.lt.u32.totalorder %s2388_s25, %s2876_s27 }
  0xc4   : > { %p2392_p9 = pneg %p2391_p1  ;;  %p2396_p10 = por %p2395_p5, %p2394_p12 }
  0xc6   : > { %p2398_p3 = por %p2397_p11, %p2396_p10 }
  0xc8   : > { %p2399_p6 = pnand %p2398_p3, %p2392_p9 }
  0xca   : > { %2402 = shalt.err (!%p2399_p6)
}
  0xcb   : > { %s2403_s10 = scalar_lea.vmem %s2879_s11, 512  ;;  %s2556_s1 = smov [#allocation3]  }
  0xcc   : > { %p2404_p4 = scmp.ne.s32.totalorder %s2879_s11, %s2403_s10  ;;  %s2408_s23 = sshll.u32 %s2556_s1, 4  ;;  %s2409_s23 = int_to_ptr.vmem [resolvable:$false] %s2408_s23 }
  0xcd   : > { %s2410_s3 = scalar_lea.vmem %s2409_s23, 1024  ;;  %p2411_p2 = scmp.lt.s32.totalorder %s2879_s11, %s2409_s23 }
  0xce   : > { %p2406_p0 = pnand %p2404_p4, %p3267_p13  ;;  %p2412_p7 = scmp.lt.s32.totalorder %s2410_s3, %s2403_s10 }
  0xd0   : > { %p2407_p8 = pneg %p2406_p0  ;;  %p2413_p1 = por %p2412_p7, %p2411_p2 }
  0xd2   : > { %p2414_p12 = pnand %p2413_p1, %p2407_p8 }
  0xd4   : > { %2417 = shalt.err (!%p2414_p12)
}
  0xd5   : > { %p3268_p9 = scmp.ne.s32.totalorder %s3259_s13, 0  ;;  %s2914_s25 = scalar_lea.hbm %s3202_s2, %s2760_s18 }
  0xd6   : > { %s385_s30 = scalar_lea.vmem [#allocation8], %s2757_s8  ;;  %s2418_s21 = scalar_lea.hbm %s2914_s25, 512 }
  0xd7   : > { %2066 = dma.hbm_to_vmem [thread:$0]  (!%p3268_p9), %s2876_s27, 512, %s2879_s11, %s2883_s24, %s3263_s26, %s3263_s26, %s3262_s20  }
  0xd8   : > { %s393_s17 = sshll.u32 %s385_s30, 4  ;;  %p2419_p5 = scmp.ne.s32.totalorder %s2914_s25, %s2418_s21  ;;  %s2917_s17 = int_to_ptr.vmem [resolvable:$true] %s393_s17 }
  0xd9   : > { %s2423_s11 = scalar_lea.hbm %s3202_s2, 1024  ;;  %p2424_p3 = scmp.lt.u32.totalorder %s2914_s25, %s3202_s2 }
  0xda   : > { %p2421_p10 = pnand %p2419_p5, %p3267_p13  ;;  %p2425_p6 = scmp.lt.u32.totalorder %s2423_s11, %s2418_s21 }
  0xdb   : > { %p2427_p0 = scmp.lt.u32.totalorder %s2418_s21, %s2914_s25 }
  0xdc   : > { %p2422_p11 = pneg %p2421_p10  ;;  %p2426_p4 = por %p2425_p6, %p2424_p3 }
  0xde   : > { %p2428_p8 = por %p2427_p0, %p2426_p4 }
  0xe0   : > { %p2429_p2 = pnand %p2428_p8, %p2422_p11 }
  0xe2   : > { %2432 = shalt.err (!%p2429_p2)
}
  0xe3   : > { %s2433_s8 = scalar_lea.vmem %s2917_s17, 512  ;;  %s2557_s14 = smov [#allocation8]  }
  0xe4   : > { %p2434_p7 = scmp.ne.s32.totalorder %s2917_s17, %s2433_s8  ;;  %s2438_s10 = sshll.u32 %s2557_s14, 4  ;;  %s2439_s10 = int_to_ptr.vmem [resolvable:$false] %s2438_s10 }
  0xe5   : > { %s2440_s1 = scalar_lea.vmem %s2439_s10, 1024  ;;  %p2441_p5 = scmp.lt.s32.totalorder %s2917_s17, %s2439_s10 }
  0xe6   : > { %p2436_p1 = pnand %p2434_p7, %p3267_p13  ;;  %p2442_p10 = scmp.lt.s32.totalorder %s2440_s1, %s2433_s8 }
  0xe8   : > { %p2437_p12 = pneg %p2436_p1  ;;  %p2443_p3 = por %p2442_p10, %p2441_p5 }
  0xea   : > { %p2444_p6 = pnand %p2443_p3, %p2437_p12 }
  0xec   : > { %2447 = shalt.err (!%p2444_p6)
}
  0xed   : > { %2072 = dma.hbm_to_vmem [thread:$0]  (!%p3268_p9), %s2914_s25, 512, %s2917_s17, %s2776_s5, %s3263_s26, %s3263_s26, %s3262_s20  }
  0xee   : > { %p3269_p13 = scmp.ne.s32.totalorder %s3246_s12, 0 }
  0xef   : > { %s2947_s9 = sand.u32 (!%p3269_p13), 1, %s2530_s28   ;;  %p3270_p11 = scmp.ne.s32.totalorder (!%p3269_p13), %s3252_s22, 0 }
  0xf0   : > { %405 = sbr.rel (%p3269_p13) target bundleno = 1797 (0x705), region = 52  ;;  %s2950_s23 = sshll.u32 (!%p3269_p13), %s2947_s9, 5 }
  0xf1   : > { %s408_s13 = scalar_lea.sflag (!%p3269_p13), [#allocation4], %s2947_s9  ;;  %s2954_s3 = scalar_lea.vmem (!%p3269_p13), [#allocation3], %s2950_s23 }
  0xf7   : > { %2501 = dma.done.wait (%p3270_p11), %s408_s13, 512  }
  0xf8   : > { %2503 = vsyncadd (%p3270_p11), %s408_s13, 4294966784  ;;  %s3271_s5 = sld [smem:[#allocation28_spill]]  ;;  %s2962_s26 = scalar_lea.vmem [#allocation6], %s2950_s23 }
  0xfe   : > { %s416_s12 = sand.u32 1, %s3271_s5  }
  0xff   : > { %s417_s20 = scalar_lea.sflag [#allocation7], %s416_s12 }
 0x100   : > { %2505 = dma.done.wait (%p3270_p11), %s417_s20, 1024  }
 0x101   : > { %2507 = vsyncadd (%p3270_p11), %s417_s20, 4294966272  ;;  %s429_s15 = scalar_lea.vmem [#allocation8], %s2950_s23  ;;  %p3272_p9 = scmp.eq.s32.totalorder %s3271_s5, 0 }
 0x103   : > { %2509 = dma.done.wait (%p3272_p9), [#allocation10], 1024   ;;  %p3273_p4 = pmov %p3272_p9 }
 0x105   : > { %2511 = vsyncadd (%p3273_p4), [#allocation10], 4294966272  ;;  %p3274_p0 = pmov %p3273_p4 }
 0x107   : > { %2513 = dma.done.wait (%p3274_p0), [#allocation13], 1024   ;;  %p3275_p8 = pmov %p3274_p0 }
 0x108   : > { %p3276_p2 = pmov %p3274_p0 }
 0x109   : > { %2515 = vsyncadd (%p3275_p8), [#allocation13], 4294966272 }
 0x10a   : > { %2517 = dma.done.wait (%p3276_p2), [#allocation16], 512   ;;  %p3277_p7 = pmov %p3274_p0 }
 0x10b   : > { %vm517_vm0 = vcmask 261120   ;;  %v509_v0 = vld [vmem:[%s429_s15] sm:$0xff]  ;;  %v510_v1 = vld [vmem:[%s429_s15 + $0x8] sm:$0xff]  ;;  %v511_v2 = vld [vmem:[%s429_s15 + $0x10] sm:$0xff]  ;;  %v2558_v44 = vmov 0   ;;  %v2559_v58 = vmov 0.0|0.0  }
 0x10c   : > { %2519 = vsyncadd (%p3277_p7), [#allocation16], 4294966784  ;;  %v1963_v3 = vpack.c.bf16 %v510_v1, %v509_v0  ;;  %v512_v4 = vld [vmem:[%s429_s15 + $0x18] sm:$0xff]  ;;  %v513_v5 = vld [vmem:[#allocation9] sm:$0xff]  ;;  %2150 = vset.pattern.permute.xlu1 %v2558_v44  ;;  %vm2560_vm1 = vmmov 0   ;;  %vm1136_vm2 = vcmask 130112  }
 0x10d   : > { %v1967_v6 = vpack.c.bf16 %v512_v4, %v511_v2  ;;  %1850 = vmatprep.mubr.msk.f32.mxu0 %vm517_vm0, %v513_v5  ;;  %v514_v7 = vld [vmem:[#allocation9 + $0x8] sm:$0xff]  ;;  %v515_v8 = vld [vmem:[#allocation9 + $0x10] sm:$0xff]  ;;  %v516_v9 = vld [vmem:[#allocation9 + $0x18] sm:$0xff]  ;;  %vm1143_vm3 = vcmask 195712   ;;  %vm1150_vm4 = vcmask 261312   ;;  %vm1157_vm5 = vcmask 326912  }
 0x10e   : > { %1964 = vmatprep.subr.bf16.mxu0 %v1963_v3  ;;  %v2986_v10 = vld [vmem:[%s2954_s3] sm:$0xff]  ;;  %v2989_v11 = vld [vmem:[%s2954_s3 + $0x8] sm:$0xff]  ;;  %v2994_v14 = vld [vmem:[%s2954_s3 + $0x10] sm:$0xff]  ;;  %vm1164_vm6 = vcmask 392512   ;;  %vm1171_vm7 = vcmask 458112   ;;  %vm1178_vm8 = vcmask 523712  }
 0x10f   : > { %1966 = vmatpush3.bf16.msra.mxu0 %v1963_v3  ;;  %v1971_v12 = vpack.c.bf16 %v2989_v11, %v2986_v10  ;;  %v2997_v15 = vld [vmem:[%s2954_s3 + $0x18] sm:$0xff]  ;;  %v505_v20 = vld [vmem:[%s2962_s26] sm:$0xff]  ;;  %v506_v21 = vld [vmem:[%s2962_s26 + $0x8] sm:$0xff]  ;;  %vm1185_vm9 = vcmask 589312   ;;  %vm1192_vm10 = vcmask 654912   ;;  %vm1199_vm11 = vcmask 720512  }
 0x110   : > { %1968 = vmatprep.subr.bf16.mxu0 %v1967_v6  ;;  %v1975_v17 = vpack.c.bf16 %v2997_v15, %v2994_v14  ;;  %v507_v22 = vld [vmem:[%s2962_s26 + $0x10] sm:$0xff]  ;;  %v1979_v23 = vpack.c.bf16 %v506_v21, %v505_v20  ;;  %v508_v24 = vld [vmem:[%s2962_s26 + $0x18] sm:$0xff]  ;;  %v984_v25 = vld [vmem:[#allocation11] sm:$0xff]  ;;  %vm1206_vm12 = vcmask 786112   ;;  %vm1213_vm13 = vcmask 851712   ;;  %s3278_s22 = sld [smem:[#allocation25_spill]] }
 0x111   : > { %1972 = vmatprep.subr.bf16.mxu1 %v1971_v12  ;;  %v1983_v26 = vpack.c.bf16 %v508_v24, %v507_v22  ;;  %v985_v27 = vld [vmem:[#allocation11 + $0x8] sm:$0xff]  ;;  %v988_v53 = vld [vmem:[#allocation12] sm:$0xff]  ;;  %v986_v63 = vld [vmem:[#allocation11 + $0x10] sm:$0xff]  ;;  %vm1220_vm14 = vcmask 917312   ;;  %vm1227_vm15 = vcmask 982912   ;;  %s491_s16 = scalar_lea.vmem [#allocation17], %s2950_s23 }
 0x112   : > { %1974 = vmatpush3.bf16.msra.mxu1 %v1971_v12  ;;  %v987_v0 = vld [vmem:[#allocation11 + $0x18] sm:$0xff]  ;;  %s1535_s25 = sshll.u32 %s491_s16, 4  ;;  %s3279_s30 = sld [smem:[#allocation30_spill]]  ;;  %s3144_s25 = int_to_ptr.vmem [resolvable:$true] %s1535_s25 }
 0x113   : > { %1970 = vmatpush3.bf16.msra.mxu0 %v1967_v6  ;;  %1976 = vmatprep.subr.bf16.mxu1 %v1975_v17  ;;  %s3280_s27 = sld [smem:[#allocation36_spill]]  ;;  %s1522_s18 = scalar_lea.sflag [#allocation5], %s2947_s9 }
 0x114   : > { %1980 = vmatprep.subr.bf16.mxu0 %v1979_v23  ;;  %s2448_s8 = scalar_lea.vmem %s3144_s25, 512  ;;  %s2562_s14 = smov [#allocation17]  }
 0x115   : > { %p2449_p1 = scmp.ne.s32.totalorder %s3144_s25, %s2448_s8  ;;  %s2452_s10 = sshll.u32 %s2562_s14, 4  ;;  %s2453_s10 = int_to_ptr.vmem [resolvable:$false] %s2452_s10 }
 0x116   : > { %1851 = vmatmul.mubr.msk.f32.vlgmr.msra.gmra.mrb[0].mxu0 %vm517_vm0, %v514_v7  ;;  %1978 = vmatpush3.bf16.msra.mxu1 %v1975_v17  ;;  %s1776_s17 = sshll.u32 %s3278_s22, 9  ;;  %s2454_s1 = scalar_lea.vmem %s2453_s10, 1024 }
 0x117   : > { %1853 = vmatprep.mubr.msk.f32.mxu0 %vm517_vm0, %v515_v8  ;;  %1982 = vmatpush3.bf16.msra.mxu0 %v1979_v23  ;;  %p2455_p3 = scmp.lt.s32.totalorder %s3144_s25, %s2453_s10  ;;  %p2456_p6 = scmp.lt.s32.totalorder %s2454_s1, %s2448_s8 }
 0x118   : > { %1984 = vmatprep.subr.bf16.mxu0 %v1983_v26  ;;  %1987 = vmatprep.subr.bf16.mxu1 %v2559_v58  ;;  %p3282_p12 = scmp.ne.s32.totalorder %s3279_s30, 0 }
 0x119   : > { %s3281_s11 = smov %s3280_s27  ;;  %s3150_s24 = scalar_lea.hbm %s3280_s27, %s1776_s17 }
 0x11a   : > { %1854 = vmatmul.mubr.msk.f32.gmra.mrb[2].mxu0 %vm517_vm0, %v516_v9  ;;  %p2450_p5 = pnand %p2449_p1, %p3282_p12  ;;  %p2457_p13 = por %p2456_p6, %p2455_p3 }
 0x11b   : > { %1896 = vmatprep.mubr.msk.f32.mxu0 %vm517_vm0, %v984_v25  ;;  %1986 = vmatpush3.bf16.msra.mxu0 %v1983_v26 }
 0x11c   : > { %p2451_p10 = pneg %p2450_p5 }
 0x11e   : > { %1897 = vmatmul.mubr.msk.f32.vlgmr.msra.gmra.mrb[4].mxu0 %vm517_vm0, %v985_v27  ;;  %p2458_p11 = pnand %p2457_p13, %p2451_p10 }
 0x11f   : > { %1899 = vmatprep.mubr.msk.f32.mxu0 %vm517_vm0, %v986_v63 }
 0x122   : > { %1900 = vmatmul.mubr.msk.f32.gmra.mrb[6].mxu0 %vm517_vm0, %v987_v0 }
 0x1e9   : > { %v1852_v13 = vpop.f32.mrb[0].mxu0 }
 0x1ea   : > { %v596_v16 = vpop.f32.mrb[1].mxu0 }
 0x1eb   : > { %615 = vxpose.xlu0.b32.start [1/4] (short) %v596_v16, 128 }
 0x1ed   : > { %v1855_v18 = vpop.f32.mrb[2].mxu0 }
 0x1ee   : > { %v606_v19 = vpop.f32.mrb[3].mxu0 }
 0x1ef   : > { %616 = vxpose.xlu0.b32.cont [2/4] (short) %v1852_v13, 128 }
 0x1f1   : > { %v3031_v56 = vpop.f32.mrb[4].mxu0 }
 0x1f2   : > { %v1090_v57 = vpop.f32.mrb[5].mxu0 }
 0x1f3   : > { %617 = vxpose.xlu0.b32.cont [3/4] (short) %v606_v19, 128 }
 0x1f7   : > { %618 = vxpose.xlu0.b32.end [4/4] (short) %v1855_v18, 128 }
 0x220   : > { %2151 = vset.pattern.permute.xlu0 %v2558_v44 }
 0x26b   : > { %v631_v28 = vpop.trf.xlu0 }
 0x26c   : > { %1864 = vmatprep.mubr.msk.f32.mxu1 %vm517_vm0, %v631_v28 }
 0x26f   : > { %v632_v29 = vpop.trf.xlu0 }
 0x270   : > { %1865 = vmatmul.mubr.msk.f32.vlgmr.msra.gmra.mrb[0].mxu1 %vm517_vm0, %v632_v29 }
 0x273   : > { %v633_v30 = vpop.trf.xlu0 }
 0x274   : > { %1867 = vmatprep.mubr.msk.f32.mxu1 %vm517_vm0, %v633_v30 }
 0x277   : > { %v634_v31 = vpop.trf.xlu0 }
 0x278   : > { %1868 = vmatmul.mubr.msk.f32.gmra.mrb[2].mxu1 %vm517_vm0, %v634_v31 }
 0x27b   : > { %v635_v32 = vpop.trf.xlu0 }
 0x27c   : > { %1870 = vmatprep.mubr.msk.f32.mxu1 %vm517_vm0, %v635_v32 }
 0x27f   : > { %v636_v33 = vpop.trf.xlu0 }
 0x280   : > { %1871 = vmatmul.mubr.msk.f32.gmra.mrb[4].mxu1 %vm517_vm0, %v636_v33 }
 0x283   : > { %v637_v34 = vpop.trf.xlu0 }
 0x284   : > { %1873 = vmatprep.mubr.msk.f32.mxu1 %vm517_vm0, %v637_v34 }
 0x287   : > { %v638_v35 = vpop.trf.xlu0 }
 0x288   : > { %1874 = vmatmul.mubr.msk.f32.gmra.mrb[6].mxu1 %vm517_vm0, %v638_v35 }
 0x28b   : > { %v639_v36 = vpop.trf.xlu0 }
 0x28c   : > { %1876 = vmatprep.mubr.msk.f32.mxu1 %vm517_vm0, %v639_v36 }
 0x28f   : > { %v640_v37 = vpop.trf.xlu0 }
 0x290   : > { %1877 = vmatmul.mubr.msk.f32.gmra.mrb[8].mxu1 %vm517_vm0, %v640_v37 }
 0x293   : > { %v641_v38 = vpop.trf.xlu0 }
 0x294   : > { %1879 = vmatprep.mubr.msk.f32.mxu1 %vm517_vm0, %v641_v38 }
 0x297   : > { %v642_v39 = vpop.trf.xlu0 }
 0x298   : > { %1880 = vmatmul.mubr.msk.f32.gmra.mrb[10].mxu1 %vm517_vm0, %v642_v39 }
 0x29b   : > { %v643_v40 = vpop.trf.xlu0 }
 0x29c   : > { %1882 = vmatprep.mubr.msk.f32.mxu1 %vm517_vm0, %v643_v40 }
 0x29f   : > { %v644_v41 = vpop.trf.xlu0 }
 0x2a0   : > { %1883 = vmatmul.mubr.msk.f32.gmra.mrb[12].mxu1 %vm517_vm0, %v644_v41 }
 0x2a3   : > { %v645_v42 = vpop.trf.xlu0 }
 0x2a4   : > { %1885 = vmatprep.mubr.msk.f32.mxu1 %vm517_vm0, %v645_v42 }
 0x2a7   : > { %v646_v43 = vpop.trf.xlu0 }
 0x2a8   : > { %1886 = vmatmul.mubr.msk.f32.gmra.mrb[14].mxu1 %vm517_vm0, %v646_v43 }
 0x343   : > { %v1866_v45 = vpop.f32.mrb[0].mxu1 }
 0x344   : > { %842 = vmax.xlane.f32.xlu1 %v1866_v45  ;;  %v761_v46 = vpop.f32.mrb[1].mxu1 }
 0x348   : > { %840 = vmax.xlane.f32.xlu1 %v761_v46 }
 0x34b   : > { %v1869_v47 = vpop.f32.mrb[2].mxu1 }
 0x34c   : > { %846 = vmax.xlane.f32.xlu1 %v1869_v47  ;;  %v771_v48 = vpop.f32.mrb[3].mxu1 }
 0x350   : > { %844 = vmax.xlane.f32.xlu1 %v771_v48 }
 0x353   : > { %v1872_v49 = vpop.f32.mrb[4].mxu1 }
 0x354   : > { %850 = vmax.xlane.f32.xlu1 %v1872_v49  ;;  %v781_v50 = vpop.f32.mrb[5].mxu1 }
 0x355   : > { %848 = vmax.xlane.f32.xlu0 %v781_v50 }
 0x35b   : > { %v3023_v51 = vpop.f32.mrb[6].mxu1 }
 0x35c   : > { %v3025_v52 = vpop.f32.mrb[7].mxu1 }
 0x363   : > { %v3027_v54 = vpop.f32.mrb[8].mxu1 }
 0x364   : > { %v3029_v55 = vpop.f32.mrb[9].mxu1 }
 0x365   : > { %994 = vperm.xlu1 %2150, %v988_v53  }
 0x36b   : > { %v3034_v59 = vpop.f32.mrb[10].mxu1 }
 0x36c   : > { %v3036_v60 = vpop.f32.mrb[11].mxu1 }
 0x373   : > { %v3038_v61 = vpop.f32.mrb[12].mxu1 }
 0x374   : > { %v3040_v62 = vpop.f32.mrb[13].mxu1 }
 0x37b   : > { %v3044_v1 = vpop.f32.mrb[14].mxu1 }
 0x37c   : > { %v3046_v2 = vpop.f32.mrb[15].mxu1 }
 0x389   : > { %854 = vmax.xlane.f32.xlu1 %v3023_v51 }
 0x38d   : > { %852 = vmax.xlane.f32.xlu1 %v3025_v52 }
 0x391   : > { %858 = vmax.xlane.f32.xlu1 %v3027_v54 }
 0x395   : > { %856 = vmax.xlane.f32.xlu1 %v3029_v55 }
 0x399   : > { %862 = vmax.xlane.f32.xlu1 %v3034_v59 }
 0x39d   : > { %860 = vmax.xlane.f32.xlu1 %v3036_v60 }
 0x3a1   : > { %866 = vmax.xlane.f32.xlu1 %v3038_v61 }
 0x3a5   : > { %864 = vmax.xlane.f32.xlu1 %v3040_v62 }
 0x3a9   : > { %870 = vmax.xlane.f32.xlu1 %v3044_v1 }
 0x3ad   : > { %868 = vmax.xlane.f32.xlu1 %v3046_v2 }
 0x3d1   : > { %v843_v3 = vpop.xlane.xlu1 %842 }
 0x3d2   : > { %v873_v4 = vsub.f32 %v1866_v45, %v843_v3 }
 0x3d4   : > { %v890_v5 = vmul.f32 1.442695, %v873_v4 }
 0x3d5   : > { %v841_v6 = vpop.xlane.xlu1 %840 }
 0x3d6   : > { %2152 = vpow2.f32 %v890_v5  ;;  %v872_v7 = vsub.f32 %v761_v46, %v841_v6 }
 0x3d8   : > { %v888_v8 = vmul.f32 1.442695, %v872_v7 }
 0x3d9   : > { %v847_v9 = vpop.xlane.xlu1 %846 }
 0x3da   : > { %2154 = vpow2.f32 %v888_v8  ;;  %v875_v12 = vsub.f32 %v1869_v47, %v847_v9 }
 0x3dc   : > { %v894_v13 = vmul.f32 1.442695, %v875_v12 }
 0x3dd   : > { %v845_v16 = vpop.xlane.xlu1 %844 }
 0x3de   : > { %2156 = vpow2.f32 %v894_v13  ;;  %v874_v17 = vsub.f32 %v771_v48, %v845_v16 }
 0x3e0   : > { %v2153_v18 = vpop.eup %2152  ;;  %v892_v19 = vmul.f32 1.442695, %v874_v17 }
 0x3e1   : > { %v851_v20 = vpop.xlane.xlu1 %850  ;;  %922 = vadd.xlane.f32.xlu1 %v2153_v18 }
 0x3e2   : > { %2158 = vpow2.f32 %v892_v19  ;;  %v877_v21 = vsub.f32 %v1872_v49, %v851_v20  ;;  %v849_v22 = vpop.xlane.xlu0 %848 }
 0x3e3   : > { %v876_v23 = vsub.f32 %v781_v50, %v849_v22 }
 0x3e4   : > { %v2155_v24 = vpop.eup %2154  ;;  %v898_v25 = vmul.f32 1.442695, %v877_v21 }
 0x3e5   : > { %v896_v26 = vmul.f32 1.442695, %v876_v23  ;;  %v995_v27 = vpop.permute.xlu1 %994  ;;  %920 = vadd.xlane.f32.xlu1 %v2155_v24  ;;  %v1988_v28 = vpack.c.bf16 %v2153_v18, %v2155_v24  ;;  %v990_v24 = vld [vmem:[#allocation12 + $0x10] sm:$0xff] }
 0x3e6   : > { %2160 = vpow2.f32 %v898_v25  ;;  %v3058_v29 = vadd.f32 %v1090_v57, %v995_v27  ;;  %v991_v27 = vld [vmem:[#allocation12 + $0x18] sm:$0xff] }
 0x3e7   : > { %2162 = vpow2.f32 %v896_v26  ;;  %1989 = vmatpush3.bf16.msra.mxu1 %v1988_v28  ;;  %v989_v26 = vld [vmem:[#allocation12 + $0x8] sm:$0xff]  ;;  %v1388_v28 = vld [vmem:[#allocation15] sm:$0xff] }
 0x3e8   : > { %v2157_v30 = vpop.eup %2156  ;;  %1990 = vmatprep.subr.bf16.mxu1 %v2559_v58 }
 0x3e9   : > { %926 = vadd.xlane.f32.xlu1 %v2157_v30 }
 0x3ec   : > { %v2159_v31 = vpop.eup %2158 }
 0x3ed   : > { %924 = vadd.xlane.f32.xlu1 %v2159_v31  ;;  %v1991_v32 = vpack.c.bf16 %v2157_v30, %v2159_v31  ;;  %v1389_v30 = vld [vmem:[#allocation15 + $0x8] sm:$0xff]  ;;  %v1391_v31 = vld [vmem:[#allocation15 + $0x18] sm:$0xff] }
 0x3ef   : > { %1992 = vmatpush3.bf16.msra.mxu1 %v1991_v32  ;;  %v2561_v32 = vmov 0.0  }
 0x3f0   : > { %v2161_v33 = vpop.eup %2160  ;;  %1993 = vmatprep.subr.bf16.mxu1 %v2559_v58  ;;  %1934 = vmatprep.mubr.msk.f32.mxu1 %vm2560_vm1, %v2561_v32 }
 0x3f1   : > { %v2163_v34 = vpop.eup %2162  ;;  %930 = vadd.xlane.f32.xlu1 %v2161_v33 }
 0x3f2   : > { %v1994_v35 = vpack.c.bf16 %v2161_v33, %v2163_v34 }
 0x3f4   : > { %1995 = vmatpush3.bf16.msra.mxu1 %v1994_v35 }
 0x3f5   : > { %928 = vadd.xlane.f32.xlu1 %v2163_v34  ;;  %1996 = vmatprep.subr.bf16.mxu1 %v2559_v58 }
 0x416   : > { %v855_v36 = vpop.xlane.xlu1 %854 }
 0x417   : > { %v879_v37 = vsub.f32 %v3023_v51, %v855_v36 }
 0x419   : > { %v902_v38 = vmul.f32 1.442695, %v879_v37 }
 0x41a   : > { %v853_v39 = vpop.xlane.xlu1 %852 }
 0x41b   : > { %2164 = vpow2.f32 %v902_v38  ;;  %v878_v40 = vsub.f32 %v3025_v52, %v853_v39 }
 0x41d   : > { %v900_v41 = vmul.f32 1.442695, %v878_v40 }
 0x41e   : > { %v859_v42 = vpop.xlane.xlu1 %858 }
 0x41f   : > { %2166 = vpow2.f32 %v900_v41  ;;  %v881_v43 = vsub.f32 %v3027_v54, %v859_v42  ;;  %v1125_v42 = vlaneseq }
 0x421   : > { %v906_v44 = vmul.f32 1.442695, %v881_v43 }
 0x422   : > { %v857_v45 = vpop.xlane.xlu1 %856 }
 0x423   : > { %2168 = vpow2.f32 %v906_v44  ;;  %v880_v46 = vsub.f32 %v3029_v55, %v857_v45  ;;  %v3083_v44 = vand.u32 127, %v1125_v42 }
 0x425   : > { %v2165_v47 = vpop.eup %2164  ;;  %v904_v48 = vmul.f32 1.442695, %v880_v46  ;;  %v1138_v45 = vadd.s32 4294967280, %v3083_v44  ;;  %v3086_v46 = vshrl.u32 %v1125_v42, 7 }
 0x426   : > { %v863_v49 = vpop.xlane.xlu1 %862  ;;  %934 = vadd.xlane.f32.xlu1 %v2165_v47 }
 0x427   : > { %2170 = vpow2.f32 %v904_v48  ;;  %v883_v50 = vsub.f32 %v3034_v59, %v863_v49  ;;  %v1129_v49 = vsub.s32 %v3083_v44, %v3086_v46 }
 0x429   : > { %v2167_v51 = vpop.eup %2166  ;;  %v910_v53 = vmul.f32 1.442695, %v883_v50 }
 0x42a   : > { %v861_v52 = vpop.xlane.xlu1 %860  ;;  %932 = vadd.xlane.f32.xlu1 %v2167_v51  ;;  %v1997_v57 = vpack.c.bf16 %v2165_v47, %v2167_v51  ;;  %v1131_v47 = vadd.s32 4294967288, %v3083_v44  ;;  %v1141_v51 = vsub.s32 %v1138_v45, %v3086_v46  ;;  %v1201_v45 = vadd.s32 4294967208, %v3083_v44 }
 0x42b   : > { %2172 = vpow2.f32 %v910_v53  ;;  %v882_v54 = vsub.f32 %v3036_v60, %v861_v52  ;;  %v1152_v53 = vadd.s32 4294967264, %v3083_v44 }
 0x42c   : > { %1998 = vmatpush3.bf16.msra.mxu1 %v1997_v57  ;;  %v1134_v57 = vsub.s32 %v1131_v47, %v3086_v46 }
 0x42d   : > { %v2169_v63 = vpop.eup %2168  ;;  %v908_v0 = vmul.f32 1.442695, %v882_v54  ;;  %1999 = vmatprep.subr.bf16.mxu1 %v2559_v58  ;;  %v1145_v54 = vadd.s32 4294967272, %v3083_v44 }
 0x42e   : > { %v867_v55 = vpop.xlane.xlu1 %866  ;;  %938 = vadd.xlane.f32.xlu1 %v2169_v63 }
 0x42f   : > { %2174 = vpow2.f32 %v908_v0  ;;  %v885_v3 = vsub.f32 %v3038_v61, %v867_v55  ;;  %v1166_v55 = vadd.s32 4294967248, %v3083_v44 }
 0x431   : > { %v2171_v4 = vpop.eup %2170  ;;  %v914_v59 = vmul.f32 1.442695, %v885_v3 }
 0x432   : > { %v865_v5 = vpop.xlane.xlu1 %864  ;;  %936 = vadd.xlane.f32.xlu1 %v2171_v4  ;;  %v2000_v6 = vpack.c.bf16 %v2169_v63, %v2171_v4  ;;  %v1155_v4 = vsub.s32 %v1152_v53, %v3086_v46 }
 0x433   : > { %2176 = vpow2.f32 %v914_v59  ;;  %v884_v7 = vsub.f32 %v3040_v62, %v865_v5 }
 0x434   : > { %2001 = vmatpush3.bf16.msra.mxu1 %v2000_v6 }
 0x435   : > { %v2173_v60 = vpop.eup %2172  ;;  %v912_v8 = vmul.f32 1.442695, %v884_v7  ;;  %2002 = vmatprep.subr.bf16.mxu1 %v2559_v58  ;;  %v1148_v7 = vsub.s32 %v1145_v54, %v3086_v46  ;;  %v1204_v54 = vsub.s32 %v1201_v45, %v3086_v46 }
 0x436   : > { %v871_v9 = vpop.xlane.xlu1 %870  ;;  %942 = vadd.xlane.f32.xlu1 %v2173_v60 }
 0x437   : > { %2178 = vpow2.f32 %v912_v8  ;;  %v887_v12 = vsub.f32 %v3044_v1, %v871_v9 }
 0x439   : > { %v2175_v13 = vpop.eup %2174  ;;  %v918_v61 = vmul.f32 1.442695, %v887_v12  ;;  %v1169_v12 = vsub.s32 %v1166_v55, %v3086_v46  ;;  %v1222_v55 = vadd.s32 4294967184, %v3083_v44 }
 0x43a   : > { %940 = vadd.xlane.f32.xlu1 %v2175_v13  ;;  %v869_v16 = vpop.xlane.xlu1 %868  ;;  %v2003_v17 = vpack.c.bf16 %v2173_v60, %v2175_v13  ;;  %v1159_v60 = vadd.s32 4294967256, %v3083_v44 }
 0x43b   : > { %2180 = vpow2.f32 %v918_v61  ;;  %v886_v18 = vsub.f32 %v3046_v2, %v869_v16  ;;  %v3077_v2 = vpop.f32.mrb[6].mxu0  ;;  %v1180_v16 = vadd.s32 4294967232, %v3083_v44 }
 0x43c   : > { %2004 = vmatpush3.bf16.msra.mxu1 %v2003_v17  ;;  %v3079_v25 = vpop.f32.mrb[7].mxu0 }
 0x43d   : > { %v2177_v62 = vpop.eup %2176  ;;  %v916_v19 = vmul.f32 1.442695, %v886_v18  ;;  %2005 = vmatprep.subr.bf16.mxu1 %v2559_v58 }
 0x43e   : > { %946 = vadd.xlane.f32.xlu0 %v2177_v62 }
 0x43f   : > { %2182 = vpow2.f32 %v916_v19  ;;  %v1162_v19 = vsub.s32 %v1159_v60, %v3086_v46 }
 0x441   : > { %v2179_v20 = vpop.eup %2178 }
 0x442   : > { %944 = vadd.xlane.f32.xlu1 %v2179_v20  ;;  %v2006_v21 = vpack.c.bf16 %v2177_v62, %v2179_v20  ;;  %v1173_v20 = vadd.s32 4294967240, %v3083_v44 }
 0x444   : > { %2007 = vmatpush3.bf16.msra.mxu1 %v2006_v21 }
 0x445   : > { %v2181_v1 = vpop.eup %2180  ;;  %2008 = vmatprep.subr.bf16.mxu1 %v2559_v58  ;;  %v1390_v58 = vld [vmem:[#allocation15 + $0x10] sm:$0xff] }
 0x446   : > { %950 = vadd.xlane.f32.xlu0 %v2181_v1 }
 0x449   : > { %v2183_v22 = vpop.eup %2182 }
 0x44a   : > { %v2009_v23 = vpack.c.bf16 %v2181_v1, %v2183_v22 }
 0x44c   : > { %2010 = vmatpush3.bf16.msra.mxu1 %v2009_v23 }
 0x453   : > { %1004 = vperm.xlu1 %2150, %v990_v24  }
 0x45c   : > { %999 = vperm.xlu0 %2151, %v989_v26  }
 0x46e   : > { %v923_v33 = vpop.xlane.xlu1 %922 }
 0x472   : > { %v921_v34 = vpop.xlane.xlu1 %920 }
 0x473   : > { %2184 = vrcp.f32 %v921_v34 }
 0x476   : > { %v927_v35 = vpop.xlane.xlu1 %926 }
 0x477   : > { %948 = vadd.xlane.f32.xlu1 %v2183_v22  ;;  %v1194_v22 = vadd.s32 4294967216, %v3083_v44 }
 0x47a   : > { %v925_v36 = vpop.xlane.xlu1 %924 }
 0x47b   : > { %2186 = vrcp.f32 %v925_v36  ;;  %v1197_v36 = vsub.s32 %v1194_v22, %v3086_v46 }
 0x47c   : > { %2188 = vrcp.f32 %v923_v33 }
 0x47d   : > { %v2185_v50 = vpop.eup %2184 }
 0x47e   : > { %v931_v37 = vpop.xlane.xlu1 %930  ;;  %v1130_v0 = vrot.slane %v2185_v50, %v1129_v49 }
 0x482   : > { %v929_v38 = vpop.xlane.xlu1 %928 }
 0x483   : > { %2190 = vrcp.f32 %v929_v38 }
 0x484   : > { %2192 = vrcp.f32 %v927_v35 }
 0x485   : > { %v2187_v52 = vpop.eup %2186 }
 0x486   : > { %v2189_v63 = vpop.eup %2188  ;;  %v1142_v3 = vrot.slane %v2187_v52, %v1141_v51 }
 0x487   : > { %v1135_v6 = vrot.slane %v2189_v63, %v1134_v57  ;;  %v1215_v63 = vadd.s32 4294967192, %v3083_v44 }
 0x488   : > { %1009 = vperm.xlu1 %2150, %v991_v27   ;;  %v1183_v27 = vsub.s32 %v1180_v16, %v3086_v46 }
 0x489   : > { %v1137_v9 = vsel %vm1136_vm2, %v1135_v6, %v1130_v0  ;;  %vm1234_vm2 = vcmask 1048512  }
 0x48a   : > { %v1144_v13 = vsel %vm1143_vm3, %v1142_v3, %v1137_v9  ;;  %vm1254_vm3 = vcmask 1040384  }
 0x48c   : > { %1394 = vperm.xlu1 %2150, %v1388_v28  }
 0x48d   : > { %v2191_v5 = vpop.eup %2190 }
 0x48e   : > { %v2193_v8 = vpop.eup %2192  ;;  %v1156_v61 = vrot.slane %v2191_v5, %v1155_v4  ;;  %v1229_v4 = vadd.s32 4294967176, %v3083_v44 }
 0x48f   : > { %v1149_v62 = vrot.slane %v2193_v8, %v1148_v7  ;;  %v1218_v7 = vsub.s32 %v1215_v63, %v3086_v46  ;;  %v1225_v8 = vsub.s32 %v1222_v55, %v3086_v46 }
 0x490   : > { %1399 = vperm.xlu1 %2150, %v1389_v30   ;;  %v1232_v9 = vsub.s32 %v1229_v4, %v3086_v46 }
 0x491   : > { %v1151_v1 = vsel %vm1150_vm4, %v1149_v62, %v1144_v13 }
 0x492   : > { %v1158_v24 = vsel %vm1157_vm5, %v1156_v61, %v1151_v1 }
 0x494   : > { %1404 = vperm.xlu1 %2150, %v1390_v58   ;;  %v1176_v58 = vsub.s32 %v1173_v20, %v3086_v46 }
 0x498   : > { %1409 = vperm.xlu1 %2150, %v1391_v31   ;;  %v1187_v31 = vadd.s32 4294967224, %v3083_v44 }
 0x4b3   : > { %v935_v39 = vpop.xlane.xlu1 %934 }
 0x4b7   : > { %v933_v40 = vpop.xlane.xlu1 %932 }
 0x4b8   : > { %2194 = vrcp.f32 %v933_v40  ;;  %v1208_v40 = vadd.s32 4294967200, %v3083_v44 }
 0x4b9   : > { %2196 = vrcp.f32 %v931_v37 }
 0x4ba   : > { %v1211_v53 = vsub.s32 %v1208_v40, %v3086_v46 }
 0x4bb   : > { %v939_v41 = vpop.xlane.xlu1 %938 }
 0x4bf   : > { %v937_v43 = vpop.xlane.xlu1 %936 }
 0x4c0   : > { %2198 = vrcp.f32 %v937_v43  ;;  %v1190_v43 = vsub.s32 %v1187_v31, %v3086_v46 }
 0x4c1   : > { %2200 = vrcp.f32 %v935_v39 }
 0x4c2   : > { %v2195_v18 = vpop.eup %2194 }
 0x4c3   : > { %v943_v48 = vpop.xlane.xlu1 %942  ;;  %v2197_v21 = vpop.eup %2196  ;;  %v1170_v26 = vrot.slane %v2195_v18, %v1169_v12 }
 0x4c4   : > { %v1163_v30 = vrot.slane %v2197_v21, %v1162_v19 }
 0x4c6   : > { %v1165_v35 = vsel %vm1164_vm6, %v1163_v30, %v1158_v24 }
 0x4c7   : > { %v941_v59 = vpop.xlane.xlu1 %940  ;;  %v1172_v38 = vsel %vm1171_vm7, %v1170_v26, %v1165_v35 }
 0x4c8   : > { %2202 = vrcp.f32 %v941_v59 }
 0x4c9   : > { %2204 = vrcp.f32 %v939_v41 }
 0x4ca   : > { %v2199_v28 = vpop.eup %2198 }
 0x4cb   : > { %v947_v23 = vpop.xlane.xlu0 %946  ;;  %v2201_v33 = vpop.eup %2200  ;;  %v1184_v39 = vrot.slane %v2199_v28, %v1183_v27 }
 0x4cc   : > { %v1177_v42 = vrot.slane %v2201_v33, %v1176_v58 }
 0x4ce   : > { %v1179_v49 = vsel %vm1178_vm8, %v1177_v42, %v1172_v38 }
 0x4cf   : > { %v945_v17 = vpop.xlane.xlu1 %944  ;;  %v1186_v50 = vsel %vm1185_vm9, %v1184_v39, %v1179_v49  ;;  %v1374_v39 = vsub.s32 0, %v3086_v46  ;;  %v1385_v46 = vld [vmem:[#allocation14 + $0x8] sm:$0xff] }
 0x4d0   : > { %2206 = vrcp.f32 %v945_v17 }
 0x4d1   : > { %2208 = vrcp.f32 %v943_v48 }
 0x4d2   : > { %2210 = vrcp.f32 %v947_v23  ;;  %v2203_v41 = vpop.eup %2202 }
 0x4d3   : > { %v1005_v34 = vpop.permute.xlu1 %1004  ;;  %v951_v37 = vpop.xlane.xlu0 %950  ;;  %v1198_v51 = vrot.slane %v2203_v41, %v1197_v36 }
 0x4d4   : > { %v2205_v47 = vpop.eup %2204  ;;  %2212 = vrcp.f32 %v951_v37  ;;  %v1101_v24 = vadd.f32 %v3079_v25, %v1005_v34 }
 0x4d5   : > { %v1191_v57 = vrot.slane %v2205_v47, %v1190_v43 }
 0x4d7   : > { %v1193_v3 = vsel %vm1192_vm10, %v1191_v57, %v1186_v50  ;;  %v1387_v57 = vld [vmem:[#allocation14 + $0x18] sm:$0xff] }
 0x4d8   : > { %v1200_v59 = vsel %vm1199_vm11, %v1198_v51, %v1193_v3 }
 0x4da   : > { %v2207_v52 = vpop.eup %2206 }
 0x4db   : > { %v2209_v0 = vpop.eup %2208  ;;  %v1212_v5 = vrot.slane %v2207_v52, %v1211_v53  ;;  %v1000_v19 = vpop.permute.xlu0 %999  ;;  %v1386_v52 = vld [vmem:[#allocation14 + $0x10] sm:$0xff] }
 0x4dc   : > { %v1205_v6 = vrot.slane %v2209_v0, %v1204_v54  ;;  %v2211_v60 = vpop.eup %2210  ;;  %v1096_v1 = vadd.f32 %v3031_v56, %v1000_v19 }
 0x4dd   : > { %v1219_v17 = vrot.slane %v2211_v60, %v1218_v7 }
 0x4de   : > { %v1207_v12 = vsel %vm1206_vm12, %v1205_v6, %v1200_v59  ;;  %v2213_v13 = vpop.eup %2212 }
 0x4df   : > { %v1214_v61 = vsel %vm1213_vm13, %v1212_v5, %v1207_v12  ;;  %v1233_v18 = vrot.slane %v2213_v13, %v1232_v9 }
 0x4e0   : > { %v1221_v62 = vsel %vm1220_vm14, %v1219_v17, %v1214_v61 }
 0x504   : > { %v949_v48 = vpop.xlane.xlu1 %948 }
 0x505   : > { %2214 = vrcp.f32 %v949_v48 }
 0x508   : > { %v1010_v26 = vpop.permute.xlu1 %1009 }
 0x509   : > { %v1106_v28 = vadd.f32 %v3077_v2, %v1010_v26 }
 0x50c   : > { %v1395_v54 = vpop.permute.xlu1 %1394 }
 0x50f   : > { %v2215_v16 = vpop.eup %2214 }
 0x510   : > { %v1226_v44 = vrot.slane %v2215_v16, %v1225_v8  ;;  %v1400_v63 = vpop.permute.xlu1 %1399 }
 0x512   : > { %v1228_v20 = vsel %vm1227_vm15, %v1226_v44, %v1221_v62 }
 0x513   : > { %v1235_v21 = vsel %vm1234_vm2, %v1233_v18, %v1228_v20 }
 0x514   : > { %v1249_v22 = vmul.f32 %v1235_v21, %v3058_v29  ;;  %v1250_v23 = vmul.f32 %v1235_v21, %v1096_v1  ;;  %v1251_v27 = vmul.f32 %v1235_v21, %v1101_v24  ;;  %v1252_v56 = vmul.f32 %v1235_v21, %v1106_v28  ;;  %v1384_v29 = vld [vmem:[#allocation14] sm:$0xff]  ;;  %v1405_v0 = vpop.permute.xlu1 %1404 }
 0x515   : > { %1957 = vmatprep.mubr.msk.f32.mxu0 %vm517_vm0, %v1384_v29 }
 0x516   : > { %1935 = vmatmul.mubr.f32.vlgmr.msra.gmra.mrb[16].mxu1 %v1249_v22 }
 0x517   : > { %1937 = vmatprep.mubr.msk.f32.mxu1 %vm2560_vm1, %v2561_v32 }
 0x518   : > { %v1410_v6 = vpop.permute.xlu1 %1409 }
 0x51a   : > { %1938 = vmatmul.mubr.f32.gmra.mrb[18].mxu1 %v1250_v23 }
 0x51b   : > { %1940 = vmatprep.mubr.msk.f32.mxu1 %vm2560_vm1, %v2561_v32 }
 0x51e   : > { %1941 = vmatmul.mubr.f32.gmra.mrb[20].mxu1 %v1251_v27 }
 0x51f   : > { %1943 = vmatprep.mubr.msk.f32.mxu1 %vm2560_vm1, %v2561_v32 }
 0x522   : > { %1944 = vmatmul.mubr.f32.gmra.mrb[22].mxu1 %v1252_v56 }
 0x523   : > { %1946 = vmatprep.mubr.msk.f32.mxu1 %vm2560_vm1, %v2561_v32 }
 0x526   : > { %1947 = vmatmul.mubr.msk.f32.gmra.mrb[24].mxu1 %vm1254_vm3, %v1235_v21 }
 0x5e9   : > { %v1327_v25 = vpop.f32.mrb[16].mxu1 }
 0x5ea   : > { %v1936_v30 = vpop.f32.mrb[17].mxu1 }
 0x5ed   : > { %v1332_v58 = vpop.f32.mrb[18].mxu1 }
 0x5ee   : > { %v1939_v31 = vpop.f32.mrb[19].mxu1 }
 0x5f1   : > { %v1337_v33 = vpop.f32.mrb[20].mxu1 }
 0x5f2   : > { %v1942_v2 = vpop.f32.mrb[21].mxu1 }
 0x5f5   : > { %v1342_v34 = vpop.f32.mrb[22].mxu1 }
 0x5f6   : > { %v1945_v35 = vpop.f32.mrb[23].mxu1 }
 0x5f9   : > { %v1347_v36 = vpop.f32.mrb[24].mxu1 }
 0x5fa   : > { %v1369_v37 = vadd.f32 1e-07, %v1347_v36  ;;  %v1948_v38 = vpop.f32.mrb[25].mxu1 }
 0x5fc   : > { %2216 = vrcp.f32 %v1369_v37 }
 0x606   : > { %v2217_v32 = vpop.eup %2216 }
 0x607   : > { %v1375_v40 = vrot.slane %v2217_v32, %v1374_v39 }
 0x609   : > { %v1376_v41 = vmul.f32 %v1375_v40, %v1327_v25  ;;  %v1377_v42 = vmul.f32 %v1375_v40, %v1332_v58  ;;  %v1378_v43 = vmul.f32 %v1375_v40, %v1337_v33  ;;  %v1379_v45 = vmul.f32 %v1375_v40, %v1342_v34 }
 0x60b   : > { %v1380_v47 = vsub.f32 %v2986_v10, %v1376_v41  ;;  %v1381_v48 = vsub.f32 %v2989_v11, %v1377_v42  ;;  %v1382_v49 = vsub.f32 %v2994_v14, %v1378_v43  ;;  %v1383_v50 = vsub.f32 %v2997_v15, %v1379_v45 }
 0x60d   : > { %v2011_v51 = vpack.c.bf16 %v1381_v48, %v1380_v47  ;;  %v2015_v53 = vpack.c.bf16 %v1383_v50, %v1382_v49 }
 0x60f   : > { %2012 = vmatprep.subr.bf16.mxu0 %v2011_v51 }
 0x610   : > { %2014 = vmatpush3.bf16.msra.mxu0 %v2011_v51 }
 0x611   : > { %2016 = vmatprep.subr.bf16.mxu0 %v2015_v53 }
 0x614   : > { %2018 = vmatpush3.bf16.msra.mxu0 %v2015_v53 }
 0x617   : > { %1958 = vmatmul.mubr.msk.f32.vlgmr.msra.gmra.mrb[8].mxu0 %vm517_vm0, %v1385_v46 }
 0x618   : > { %1960 = vmatprep.mubr.msk.f32.mxu0 %vm517_vm0, %v1386_v52 }
 0x61b   : > { %1961 = vmatmul.mubr.msk.f32.gmra.mrb[10].mxu0 %vm517_vm0, %v1387_v57 }
 0x6ea   : > { %v1959_v55 = vpop.f32.mrb[8].mxu0 }
 0x6eb   : > { %v1496_v3 = vadd.f32 %v1959_v55, %v1400_v63  ;;  %v1490_v4 = vpop.f32.mrb[9].mxu0 }
 0x6ec   : > { %v1491_v59 = vadd.f32 %v1490_v4, %v1395_v54 }
 0x6ed   : > { %v1510_v5 = vmax.f32 %v1496_v3, 0.0 }
 0x6ee   : > { %v1509_v7 = vmax.f32 %v1491_v59, 0.0  ;;  %v1962_v60 = vpop.f32.mrb[10].mxu0 }
 0x6ef   : > { %v1514_v8 = vadd.f32 %v1510_v5, %v2989_v11  ;;  %v1506_v9 = vadd.f32 %v1962_v60, %v1410_v6  ;;  %v1500_v12 = vpop.f32.mrb[11].mxu0 }
 0x6f0   : > { %v1513_v13 = vadd.f32 %v1509_v7, %v2986_v10  ;;  %v1501_v61 = vadd.f32 %v1500_v12, %v1405_v0 }
 0x6f1   : > { %1518 = vst [vmem:[%s491_s16 + $0x8] sm:$0xff] %v1514_v8  ;;  %v1512_v16 = vmax.f32 %v1506_v9, 0.0 }
 0x6f2   : > { %1517 = vst [vmem:[%s491_s16] sm:$0xff] %v1513_v13  ;;  %v1511_v17 = vmax.f32 %v1501_v61, 0.0 }
 0x6f3   : > { %v1516_v11 = vadd.f32 %v1512_v16, %v2997_v15 }
 0x6f4   : > { %v1515_v10 = vadd.f32 %v1511_v17, %v2994_v14 }
 0x6f5   : > { %1520 = vst [vmem:[%s491_s16 + $0x18] sm:$0xff] %v1516_v11 }
 0x6f6   : > { %1519 = vst [vmem:[%s491_s16 + $0x10] sm:$0xff] %v1515_v10 }
 0x6f7   : > { %2461 = shalt.err (!%p2458_p11)
}
 0x6f8   : > { %s2462_s23 = scalar_lea.hbm %s3150_s24, 512  ;;  %s2466_s5 = scalar_lea.hbm %s3281_s11, 1024 }
 0x6f9   : > { %p2463_p9 = scmp.ne.s32.totalorder %s3150_s24, %s2462_s23  ;;  %p2467_p8 = scmp.lt.u32.totalorder %s3150_s24, %s3281_s11 }
 0x6fa   : > { %p2468_p2 = scmp.lt.u32.totalorder %s2466_s5, %s2462_s23  ;;  %p2470_p1 = scmp.lt.u32.totalorder %s2462_s23, %s3150_s24 }
 0x6fb   : > { %p2464_p4 = pnand %p2463_p9, %p3282_p12 }
 0x6fc   : > { %p2469_p7 = por %p2468_p2, %p2467_p8 }
 0x6fd   : > { %p2465_p0 = pneg %p2464_p4 }
 0x6fe   : > { %p2471_p5 = por %p2470_p1, %p2469_p7 }
 0x700   : > { %p2472_p10 = pnand %p2471_p5, %p2465_p0 }
 0x702   : > { %2475 = shalt.err (!%p2472_p10)
}
 0x703   : > { %s2563_s26 = smov 128   ;;  %s2564_s15 = smov 8  }
 0x704   : > { %2045 = dma.vmem_to_hbm [thread:$0]  (%p3282_p12), %s3144_s25, 512, %s3150_s24, %s1522_s18, %s2563_s26, %s2563_s26, %s2564_s15  }
 0x705 PF: > { %s3283_s22 = sld [smem:[#allocation24_spill]]  ;;  %s3284_s16 = sld [smem:[#allocation32_spill]] }
 0x706   : > { %s3285_s17 = sld [smem:[#allocation27_spill]] }
 0x70b   : > { %s1550_s21 = sand.u32 1, %s3283_s22   ;;  %p3286_p3 = scmp.ne.s32.totalorder %s3284_s16, 0 }
 0x70c   : > { %p3287_p6 = scmp.ge.s32.totalorder %s3285_s17, 2  ;;  %s1551_s19 = scalar_lea.sflag [#allocation5], %s1550_s21 }
 0x70e   : > { %p2074_p13 = pnand %p3287_p6, %p3286_p3 }
 0x710   : > { %2521 = dma.done.wait (!%p2074_p13), %s1551_s19, 512  }
 0x711   : > { %2523 = vsyncadd (!%p2074_p13), %s1551_s19, 4294966784  ;;  %s30_s10 = sadd.s32 1, %s3285_s17   ;;  %s3288_s8 = sld [smem:[#allocation31_spill]] }
 0x712   : > { %p27_p11 = scmp.ge.s32.totalorder %s30_s10, 4   ;;  %s3289_s30 = sld [smem:[#allocation26_spill]] }
 0x713   : > { %s3290_s9 = sld [smem:[#allocation29_spill]]  ;;  %s3291_s27 = smov %s2530_s28 }
 0x714   : > { %s3292_s28 = smov %s2534_s29  ;;  %29 = sbr.rel (!%p27_p11) target bundleno = 16 (0x10), region = 149 }
 0x717   : > { %s3293_s29 = smov %s3288_s8 }
 0x71b   :  { %1556 = vsyncpa [#allocation4], 1 }
 0x71c   :  { %1558 = vsyncpa [#allocation4 + $0x1], 1 }
 0x71d   :  { %1559 = vsyncpa [#allocation7], 1 }
 0x71e   :  { %1561 = vsyncpa [#allocation7 + $0x1], 1 }
 0x71f   :  { %1562 = vsyncpa [#allocation10], 1 }
 0x720   :  { %1563 = vsyncpa [#allocation13], 1 }
 0x721   :  { %1564 = vsyncpa [#allocation16], 1 }
 0x722   :  { %1565 = vsyncpa [#allocation5], 1 }
 0x723   :  { %1567 = vsyncpa [#allocation5 + $0x1], 1 }

</bundles_post_ra>
